<compile_context>
chip_gen: v7x
topology: tpu7x:2x2x1
jax: 0.10.0
libtpu: 0.0.40
codegen_flags: <defaults>
</compile_context>

<pallas_src>
import functools

import jax
import jax.numpy as jnp
from jax import lax
from jax.experimental import pallas as pl
from jax.experimental.pallas import tpu as pltpu

_TM = 512                        # preferred M tile
_TN = 512                        # preferred N tile
_TK = 512                        # preferred K tile per reduction step
_K_FULL_MAX = 640                # K <= this -> single un-padded K block (no padding waste)
# VMEM budget: largest working set is ~12 MiB (512x512x512 GEMM, double-buffered A/B + f32 acc),
# well inside v7x's 64 MiB physical VMEM.  Keep the scoped limit <= ~48 MiB (review item 4).
_VMEM_LIMIT = 48 * 1024 * 1024


def _round_up(x, m):
    return (x + m - 1) // m * m


def _pick_m(m):
    tm = _TM if m >= _TM else _round_up(m, 16)      # align M to 16 (bf16 sublane pack)
    return _round_up(m, tm), tm


def _pick_n(n):
    if n < 128:
        return n, n                                  # full-dim block, no padding
    np_ = _round_up(n, 128)
    tn = min(_TN, np_)
    while np_ % tn:
        tn -= 128
    return np_, tn


def _pick_k(k):
    if k <= _K_FULL_MAX:
        return k, k                                  # single un-padded K block
    kp = _round_up(k, 128)
    for tk in (512, 384, 256, 128):
        if tk <= _TK and kp % tk == 0:
            return kp, tk
    return kp, 128


def _divisor(v, cands):
    for c in cands:
        if c <= v and v % c == 0:
            return c
    return v


# ----------------------- tiled matmul + fused BN-statistics kernel -----------------------

def _matmul_stats_kernel(a_ref, b_ref, o_ref, s_ref, acc_ref):
    k = pl.program_id(2)

    @pl.when(k == 0)
    def _():
        acc_ref[...] = jnp.zeros_like(acc_ref)

    acc_ref[...] += jnp.dot(a_ref[...], b_ref[...],
                            preferred_element_type=jnp.float32)

    @pl.when(k == pl.num_programs(2) - 1)
    def _():
        acc = acc_ref[...]
        o_ref[...] = acc.astype(o_ref.dtype)
        cs = jnp.sum(acc, axis=0)           # per-channel partial sum over this M tile
        cs2 = jnp.sum(acc * acc, axis=0)    # per-channel partial sum of squares
        tn = s_ref.shape[1]
        s_ref[...] = jnp.concatenate(
            [cs[None, :], cs2[None, :], jnp.zeros((6, tn), jnp.float32)], axis=0)


@functools.lru_cache(maxsize=None)
def _get_matmul_stats(mp, kp, np_, tm, tk, tn):
    gm, gn, gk = mp // tm, np_ // tn, kp // tk
    return pl.pallas_call(
        _matmul_stats_kernel,
        out_shape=(jax.ShapeDtypeStruct((mp, np_), jnp.bfloat16),
                   jax.ShapeDtypeStruct((gm * 8, np_), jnp.float32)),
        grid_spec=pltpu.PrefetchScalarGridSpec(
            num_scalar_prefetch=0,
            grid=(gm, gn, gk),
            in_specs=[pl.BlockSpec((tm, tk), lambda i, j, k: (i, k)),
                      pl.BlockSpec((tk, tn), lambda i, j, k: (k, j))],
            out_specs=[pl.BlockSpec((tm, tn), lambda i, j, k: (i, j)),
                       pl.BlockSpec((8, tn), lambda i, j, k: (i, j))],
            scratch_shapes=[pltpu.VMEM((tm, tn), jnp.float32)]),
        compiler_params=pltpu.CompilerParams(
            dimension_semantics=("parallel", "parallel", "arbitrary"),
            vmem_limit_bytes=_VMEM_LIMIT),
    )


def matmul_stats(a, b):
    """(M,K)@(K,N) bf16/f32-acc. Returns (padded output bf16, col_sum, col_sumsq)."""
    m, k = a.shape
    _, n = b.shape
    mp, tm = _pick_m(m)
    kp, tk = _pick_k(k)
    np_, tn = _pick_n(n)
    # v7x dual-TensorCore: guarantee >= 2 blocks on a parallel axis when cheaply possible.
    if mp == tm and np_ == tn and np_ % 256 == 0:
        tn = np_ // 2
    ap = jnp.pad(a.astype(jnp.bfloat16), ((0, mp - m), (0, kp - k)))
    bp = jnp.pad(b.astype(jnp.bfloat16), ((0, kp - k), (0, np_ - n)))
    out, s = _get_matmul_stats(mp, kp, np_, tm, tk, tn)(ap, bp)
    gm = mp // tm
    s = s.reshape(gm, 8, np_)
    col_sum = s[:, 0, :].sum(axis=0)[:n]
    col_sumsq = s[:, 1, :].sum(axis=0)[:n]
    return out, col_sum, col_sumsq


# -------------- tap-folded 3x3 stride-1 conv kernel (no im2col materialization) --------------

def _conv3x3_kernel(a0_ref, a1_ref, m_ref, w_ref, o_ref, s_ref, *, tm, offsets):
    # Two consecutive M blocks of the flattened padded activation give the halo; each tap
    # is a static row shift of that window, reduced on the MXU with a (cin x tn) weight slab.
    a_full = jnp.concatenate([a0_ref[...], a1_ref[...]], axis=0)      # (2*tm, cin) bf16
    acc = jnp.zeros(o_ref.shape, jnp.float32)
    for t, off in enumerate(offsets):
        acc = acc + jnp.dot(a_full[off:off + tm], w_ref[t],
                            preferred_element_type=jnp.float32)
    o_ref[...] = acc.astype(o_ref.dtype)
    msk = m_ref[...]                                                  # (tm, 1) validity mask
    am = acc * msk
    cs = jnp.sum(am, axis=0)
    cs2 = jnp.sum(am * acc, axis=0)
    tn = s_ref.shape[1]
    s_ref[...] = jnp.concatenate(
        [cs[None, :], cs2[None, :], jnp.zeros((6, tn), jnp.float32)], axis=0)


@functools.lru_cache(maxsize=None)
def _get_conv3x3(gm, tm, cin, cout, tn, wp):
    offsets = tuple(di * wp + dj for di in range(3) for dj in range(3))
    kernel = functools.partial(_conv3x3_kernel, tm=tm, offsets=offsets)
    gn = cout // tn
    return pl.pallas_call(
        kernel,
        out_shape=(jax.ShapeDtypeStruct((gm * tm, cout), jnp.bfloat16),
                   jax.ShapeDtypeStruct((gm * 8, cout), jnp.float32)),
        grid_spec=pltpu.PrefetchScalarGridSpec(
            num_scalar_prefetch=0,
            grid=(gm, gn),
            in_specs=[pl.BlockSpec((tm, cin), lambda i, j: (i, 0)),
                      pl.BlockSpec((tm, cin), lambda i, j: (i + 1, 0)),
                      pl.BlockSpec((tm, 1), lambda i, j: (i, 0)),
                      pl.BlockSpec((9, cin, tn), lambda i, j: (0, 0, j))],
            out_specs=[pl.BlockSpec((tm, tn), lambda i, j: (i, j)),
                       pl.BlockSpec((8, tn), lambda i, j: (i, j))]),
        compiler_params=pltpu.CompilerParams(
            dimension_semantics=("parallel", "parallel"),
            vmem_limit_bytes=_VMEM_LIMIT),
    )


def conv3x3_s1_stats(x, w):
    """3x3 / stride-1 / pad-1 conv with fused masked BN statistics, no im2col.

    Output is returned in 'padded-position' layout (one row per padded pixel; border rows are
    garbage and are sliced off after bn_apply). Returns None if the halo exceeds one M tile.
    """
    n, h, w_sp, cin = x.shape
    cout = w.shape[-1]
    hp, wp = h + 2, w_sp + 2
    oh, ow = h, w_sp
    if 2 * wp + 2 > _TM:
        # TODO(synk): images wider than ~250 px need a halo larger than one M tile; fall back.
        return None
    xp = jnp.pad(x.astype(jnp.bfloat16), ((0, 0), (1, 1), (1, 1), (0, 0)))
    m_pos = n * hp * wp
    tm = _TM if m_pos >= _TM else _round_up(m_pos, 16)
    gm = (m_pos + tm - 1) // tm
    a = jnp.pad(xp.reshape(m_pos, cin), ((0, (gm + 1) * tm - m_pos), (0, 0)))
    mask = jnp.pad(jnp.ones((n, oh, ow, 1), jnp.float32),
                   ((0, 0), (0, 2), (0, 2), (0, 0)))
    mask = jnp.pad(mask.reshape(m_pos, 1), ((0, gm * tm - m_pos), (0, 0)))
    tn = cout if cout <= 256 else 256          # cout=512 -> 2 parallel N blocks (v7x)
    wr = w.astype(jnp.bfloat16).reshape(9, cin, cout)
    y, s = _get_conv3x3(gm, tm, cin, cout, tn, wp)(a, a, mask, wr)
    s = s.reshape(gm, 8, cout)
    col_sum = s[:, 0, :].sum(axis=0)
    col_sumsq = s[:, 1, :].sum(axis=0)
    meta = (n, hp, wp, oh, ow, cout, n * oh * ow)
    return y, col_sum, col_sumsq, meta


# ----------------------- fused BN apply (+residual add) (+ReLU) kernel -----------------------

def _bn_apply_kernel(y_ref, sc_ref, sh_ref, o_ref, *, relu):
    out = y_ref[...].astype(jnp.float32) * sc_ref[...] + sh_ref[...]
    if relu:
        out = jnp.maximum(out, 0.0)
    o_ref[...] = out.astype(o_ref.dtype)


def _bn_apply_res_kernel(y_ref, r_ref, sc_ref, sh_ref, o_ref):
    out = (y_ref[...].astype(jnp.float32) * sc_ref[...] + sh_ref[...]
           + r_ref[...].astype(jnp.float32))
    o_ref[...] = jnp.maximum(out, 0.0).astype(o_ref.dtype)


@functools.lru_cache(maxsize=None)
def _get_bn_apply(mp, np_, tma, tnb, relu, residual):
    y_spec = pl.BlockSpec((tma, tnb), lambda i, j: (i, j))
    v_spec = pl.BlockSpec((1, tnb), lambda i, j: (0, j))
    if residual:
        kernel = _bn_apply_res_kernel
        in_specs = [y_spec, y_spec, v_spec, v_spec]
    else:
        kernel = functools.partial(_bn_apply_kernel, relu=relu)
        in_specs = [y_spec, v_spec, v_spec]
    return pl.pallas_call(
        kernel,
        out_shape=jax.ShapeDtypeStruct((mp, np_), jnp.bfloat16),
        grid_spec=pltpu.PrefetchScalarGridSpec(
            num_scalar_prefetch=0,
            grid=(mp // tma, np_ // tnb),
            in_specs=in_specs,
            out_specs=pl.BlockSpec((tma, tnb), lambda i, j: (i, j))),
        compiler_params=pltpu.CompilerParams(
            dimension_semantics=("parallel", "parallel"),
            vmem_limit_bytes=_VMEM_LIMIT),
    )


def bn_apply(y_pad, col_sum, col_sumsq, m_real, gamma, beta, relu,
             residual_pad=None, eps=1e-5):
    """Training-mode BN (biased batch variance) + optional residual add + optional ReLU."""
    mp, np_ = y_pad.shape
    c = gamma.shape[0]
    mean = col_sum / float(m_real)
    var = jnp.maximum(col_sumsq / float(m_real) - mean * mean, 0.0)
    scale = gamma * lax.rsqrt(var + eps)
    shift = beta - mean * scale
    scale = jnp.pad(scale, (0, np_ - c)).reshape(1, np_).astype(jnp.float32)
    shift = jnp.pad(shift, (0, np_ - c)).reshape(1, np_).astype(jnp.float32)
    tma = _divisor(mp, (512, 256, 128, 64, 32, 16, 8))
    tnb = np_ if np_ < 128 else _divisor(np_, (1024, 512, 256, 128))
    if mp // tma == 1 and np_ // tnb == 1 and np_ % 256 == 0:
        tnb = np_ // 2            # give v7x's second TensorCore some work
    fn = _get_bn_apply(mp, np_, tma, tnb, bool(relu), residual_pad is not None)
    if residual_pad is not None:
        return fn(y_pad, residual_pad, scale, shift)
    return fn(y_pad, scale, shift)


# ----------------------------- pooling (fused XLA per perf review) -----------------------------

def maxpool_3x3_s2_p1(x):
    # Elementwise max tree over 9 shifted strided views: XLA fuses it; no 9x HBM stack.
    n, h, w, c = x.shape
    xp = jnp.pad(x, ((0, 0), (1, 1), (1, 1), (0, 0)), constant_values=-jnp.inf)
    oh = (h + 2 - 3) // 2 + 1
    ow = (w + 2 - 3) // 2 + 1
    out = None
    for i in range(3):
        for j in range(3):
            s = xp[:, i:i + 2 * oh - 1:2, j:j + 2 * ow - 1:2, :]
            out = s if out is None else jnp.maximum(out, s)
    return out


def global_avg_pool(x):
    # Plain XLA mean; fuses into the head's first GEMM input (perf-review item 10).
    return jnp.mean(x.astype(jnp.float32), axis=(1, 2))


# ---------------- fused classifier head: resnet.fc -> fc1 -> ReLU -> BN1d -> fc2 -> ReLU ----------------

def _head_kernel(f_ref, fcw_ref, fcb_ref, w1_ref, b1_ref, g_ref, be_ref,
                 w2_ref, b2_ref, o_ref, *, count):
    # resnet.fc (2048 -> 1000)
    x = jnp.dot(f_ref[...].astype(jnp.bfloat16), fcw_ref[...],
                preferred_element_type=jnp.float32) + fcb_ref[...]
    # x = F.relu(self.fc1(x))
    h = jnp.dot(x.astype(jnp.bfloat16), w1_ref[...],
                preferred_element_type=jnp.float32) + b1_ref[...]
    h = jnp.maximum(h, 0.0)
    # x = self.batchnorm(x)   (BatchNorm1d, training-mode batch statistics, biased variance)
    mean = jnp.sum(h, axis=0, keepdims=True) * (1.0 / count)
    d = h - mean
    var = jnp.sum(d * d, axis=0, keepdims=True) * (1.0 / count)
    h = d * lax.rsqrt(var + 1e-5) * g_ref[...] + be_ref[...]
    # x = F.relu(self.fc2(x))  -- bf16 MXU operands, lane-dense padded output
    y = jnp.dot(h.astype(jnp.bfloat16), w2_ref[...],
                preferred_element_type=jnp.float32) + b2_ref[...]
    o_ref[...] = jnp.maximum(y, 0.0)


@functools.lru_cache(maxsize=None)
def _get_head(n):
    return pl.pallas_call(
        functools.partial(_head_kernel, count=float(n)),
        out_shape=jax.ShapeDtypeStruct((n, 128), jnp.float32),
        compiler_params=pltpu.CompilerParams(vmem_limit_bytes=_VMEM_LIMIT),
    )


# ----------------------------- conv / resnet glue -----------------------------

def conv2d_stats(x, w, stride=1, pad=0):
    """NHWC conv (bias-free): 1x1 goes straight to the GEMM; others via im2col fallback."""
    kh, kw, cin, cout = w.shape
    n = x.shape[0]
    if kh == 1 and kw == 1 and pad == 0:
        if stride > 1:
            x = x[:, ::stride, ::stride, :]
        _, oh, ow, _ = x.shape
        a = x.reshape(n * oh * ow, cin)
    else:
        # TODO(synk): im2col remains only for the 7x7 stem and the three stride-2 3x3 convs
        # (small output grids); stride-1 3x3 convs use the tap-folded kernel above.
        xp = jnp.pad(x, ((0, 0), (pad, pad), (pad, pad), (0, 0)))
        _, hp, wp, _ = xp.shape
        oh = (hp - kh) // stride + 1
        ow = (wp - kw) // stride + 1
        cols = []
        for i in range(kh):
            for j in range(kw):
                cols.append(xp[:, i:i + stride * (oh - 1) + 1:stride,
                                j:j + stride * (ow - 1) + 1:stride, :])
        a = jnp.stack(cols, axis=3).reshape(n * oh * ow, kh * kw * cin)
    out_pad, cs, cs2 = matmul_stats(a, w.reshape(kh * kw * cin, cout))
    return out_pad, cs, cs2, (n, oh, ow, cout)


def _unpad_nhwc(out_pad, shp):
    n, oh, ow, c = shp
    return out_pad[:n * oh * ow, :c].reshape(n, oh, ow, c)


def _unpad_conv3x3(out_pad, meta):
    n, hp, wp, oh, ow, c, _ = meta
    return out_pad[:n * hp * wp, :c].reshape(n, hp, wp, c)[:, :oh, :ow, :]


def _pad_to(a2d, target_shape):
    mp, np_ = target_shape
    m, c = a2d.shape
    return jnp.pad(a2d, ((0, mp - m), (0, np_ - c)))


def bottleneck(x, p):
    s = p['stride']
    cin = x.shape[-1]

    # conv1 (1x1) + bn1 + relu
    y, cs, cs2, shp = conv2d_stats(x, p['conv1_w'])
    m = shp[0] * shp[1] * shp[2]
    out = _unpad_nhwc(bn_apply(y, cs, cs2, m, p['bn1_g'], p['bn1_b'], relu=True), shp)

    # conv2 (3x3, stride s) + bn2 + relu
    r = conv3x3_s1_stats(out, p['conv2_w']) if s == 1 else None
    if r is not None:
        y, cs, cs2, meta = r
        out = _unpad_conv3x3(
            bn_apply(y, cs, cs2, meta[-1], p['bn2_g'], p['bn2_b'], relu=True), meta)
    else:
        y, cs, cs2, shp = conv2d_stats(out, p['conv2_w'], stride=s, pad=1)
        m = shp[0] * shp[1] * shp[2]
        out = _unpad_nhwc(bn_apply(y, cs, cs2, m, p['bn2_g'], p['bn2_b'], relu=True), shp)

    # conv3 (1x1)
    y3, cs3, cs23, shp3 = conv2d_stats(out, p['conv3_w'])
    m3 = shp3[0] * shp3[1] * shp3[2]

    # identity / downsample path, in the SAME padded (mp, np) layout as y3
    if 'ds_w' in p:
        yd, csd, cs2d, shpd = conv2d_stats(x, p['ds_w'], stride=s)
        md = shpd[0] * shpd[1] * shpd[2]
        res_pad = bn_apply(yd, csd, cs2d, md, p['ds_g'], p['ds_b'], relu=False)
    else:
        res_pad = _pad_to(x.reshape(-1, cin).astype(jnp.bfloat16), y3.shape)

    # bn3 + residual add + ReLU fused in one tiled apply kernel
    out = bn_apply(y3, cs3, cs23, m3, p['bn3_g'], p['bn3_b'], relu=True,
                   residual_pad=res_pad)
    return _unpad_nhwc(out, shp3)


def classifier_resnet_forward(params, x_nchw):
    x = jnp.transpose(x_nchw, (0, 2, 3, 1)).astype(jnp.bfloat16)   # NCHW -> NHWC, bf16 acts
    # --- resnet50 stem ---
    y, cs, cs2, shp = conv2d_stats(x, params['conv1_w'], stride=2, pad=3)
    m = shp[0] * shp[1] * shp[2]
    x = _unpad_nhwc(bn_apply(y, cs, cs2, m, params['bn1_g'], params['bn1_b'], relu=True), shp)
    x = maxpool_3x3_s2_p1(x)
    # --- resnet50 stages (3, 4, 6, 3 bottlenecks) ---
    for layer in params['layers']:
        for blk in layer:
            x = bottleneck(x, blk)
    # --- global avg pool + fused head ---
    feat = global_avg_pool(x)                                       # (N, 2048) f32
    n = feat.shape[0]
    w2 = jnp.pad(params['fc2_w'].astype(jnp.bfloat16), ((0, 0), (0, 128 - 9)))
    b2 = jnp.pad(params['fc2_b'], (0, 128 - 9)).reshape(1, 128)
    out = _get_head(n)(
        feat,
        params['fc_w'].astype(jnp.bfloat16),
        params['fc_b'].reshape(1, -1),
        params['fc1_w'].astype(jnp.bfloat16),
        params['fc1_b'].reshape(1, -1),
        params['bn1d_g'].reshape(1, -1),
        params['bn1d_b'].reshape(1, -1),
        w2,
        b2,
    )
    return out[:, :9]


# ----------------------------- deterministic params -----------------------------

class _KeyGen:
    def __init__(self, seed):
        self._key = jax.random.PRNGKey(seed)
        self._i = 0

    def __call__(self):
        self._i += 1
        return jax.random.fold_in(self._key, self._i)


def _winit(kg, shape, scale=0.05):
    return scale * jax.random.normal(kg(), shape, dtype=jnp.float32)


def init_params(seed=0):
    kg = _KeyGen(seed)
    p = {
        'conv1_w': _winit(kg, (7, 7, 3, 64)),
        'bn1_g': jnp.ones((64,), jnp.float32),
        'bn1_b': jnp.zeros((64,), jnp.float32),
    }
    layers = []
    in_c = 64
    for planes, blocks, stride in [(64, 3, 1), (128, 4, 2), (256, 6, 2), (512, 3, 2)]:
        layer = []
        for b in range(blocks):
            s = stride if b == 0 else 1
            blk = {
                'stride': s,
                'conv1_w': _winit(kg, (1, 1, in_c, planes)),
                'bn1_g': jnp.ones((planes,), jnp.float32),
                'bn1_b': jnp.zeros((planes,), jnp.float32),
                'conv2_w': _winit(kg, (3, 3, planes, planes)),
                'bn2_g': jnp.ones((planes,), jnp.float32),
                'bn2_b': jnp.zeros((planes,), jnp.float32),
                'conv3_w': _winit(kg, (1, 1, planes, planes * 4)),
                'bn3_g': jnp.ones((planes * 4,), jnp.float32),
                'bn3_b': jnp.zeros((planes * 4,), jnp.float32),
            }
            if b == 0 and (s != 1 or in_c != planes * 4):
                blk['ds_w'] = _winit(kg, (1, 1, in_c, planes * 4))
                blk['ds_g'] = jnp.ones((planes * 4,), jnp.float32)
                blk['ds_b'] = jnp.zeros((planes * 4,), jnp.float32)
            layer.append(blk)
            in_c = planes * 4
        layers.append(layer)
    p['layers'] = layers
    p['fc_w'] = _winit(kg, (2048, 1000))
    p['fc_b'] = _winit(kg, (1000,))
    # head: fc1(1000->500), BatchNorm1d(500), fc2(500->9)
    p['fc1_w'] = _winit(kg, (1000, 500))
    p['fc1_b'] = _winit(kg, (500,))
    p['bn1d_g'] = jnp.ones((500,), jnp.float32)
    p['bn1d_b'] = jnp.zeros((500,), jnp.float32)
    p['fc2_w'] = _winit(kg, (500, 9))
    p['fc2_b'] = _winit(kg, (9,))
    return p


# ----------------------------- main -----------------------------

if __name__ == "__main__":
    params = init_params(seed=0)
    key = jax.random.PRNGKey(0)
    # Small-but-valid ResNet-50 input: batch=2, 3 channels, 32x32 spatial (NCHW like PyTorch).
    x = jax.random.normal(key, (2, 3, 32, 32), dtype=jnp.float32)

    out = classifier_resnet_forward(params, x)
    out = jax.block_until_ready(out)

    assert out.shape == (2, 9), out.shape
    assert bool(jnp.all(jnp.isfinite(out)))
    print("KERNEL_OK")
</pallas_src>

<mosaic_0001>
module attributes {stable_mosaic.version = 11 : i64} {
  func.func @_matmul_stats_kernel(%arg0: i32, %arg1: i32, %arg2: i32, %arg3: memref<512x147xbf16, #tpu.memory_space<vmem>>, %arg4: memref<147x64xbf16, #tpu.memory_space<vmem>>, %arg5: memref<512x64xbf16, #tpu.memory_space<vmem>>, %arg6: memref<8x64xf32, #tpu.memory_space<vmem>>, %arg7: memref<512x64xf32, #tpu.memory_space<vmem>>) attributes {dimension_semantics = [#tpu.dimension_semantics<parallel>, #tpu.dimension_semantics<parallel>, #tpu.dimension_semantics<arbitrary>], iteration_bounds = array<i64: 1, 1, 1>, scalar_prefetch = 0 : i64, scratch_operands = 1 : i64, tpu.core_type = #tpu.core_type<tc>, window_params = [{transform_indices = @transform_0, window_bounds = array<i64: 512, 147>}, {transform_indices = @transform_1, window_bounds = array<i64: 147, 64>}, {transform_indices = @transform_2, window_bounds = array<i64: 512, 64>}, {transform_indices = @transform_3, window_bounds = array<i64: 8, 64>}]} {
    %c0_i32 = arith.constant 0 : i32
    %0 = arith.cmpi eq, %arg2, %c0_i32 : i32
    %1 = arith.extui %0 : i1 to i32
    %c0_i32_0 = arith.constant 0 : i32
    %2 = arith.cmpi ne, %1, %c0_i32_0 : i32
    scf.if %2 {
      %cst_10 = arith.constant 0.000000e+00 : f32
      %12 = vector.broadcast %cst_10 : f32 to vector<512x64xf32>
      %c0_11 = arith.constant 0 : index
      %c0_12 = arith.constant 0 : index
      %13 = vector.load %arg7[%c0_11, %c0_12] : memref<512x64xf32, #tpu.memory_space<vmem>>, vector<512x64xf32>
      tpu.vector_store %arg7[%c0_11, %c0_12], %12 {strides = array<i32>} : memref<512x64xf32, #tpu.memory_space<vmem>>, vector<512x64xf32>,
    } else {
    }
    %c0 = arith.constant 0 : index
    %c0_1 = arith.constant 0 : index
    %3 = vector.load %arg7[%c0, %c0_1] : memref<512x64xf32, #tpu.memory_space<vmem>>, vector<512x64xf32>
    %c0_2 = arith.constant 0 : index
    %c0_3 = arith.constant 0 : index
    %4 = vector.load %arg3[%c0_2, %c0_3] : memref<512x147xbf16, #tpu.memory_space<vmem>>, vector<512x147xbf16>
    %c0_4 = arith.constant 0 : index
    %c0_5 = arith.constant 0 : index
    %5 = vector.load %arg4[%c0_4, %c0_5] : memref<147x64xbf16, #tpu.memory_space<vmem>>, vector<147x64xbf16>
    %cst = arith.constant dense<0.000000e+00> : vector<512x64xf32>
    %6 = tpu.matmul %4, %5, %cst {dimension_numbers = #tpu.dot_dimension_numbers<[1], [0], [0], [1], [0, 0, 1, 1], [], []>} : vector<512x147xbf16>, vector<147x64xbf16>, vector<512x64xf32> -> vector<512x64xf32>
    %7 = arith.addf %3, %6 : vector<512x64xf32>
    %c0_6 = arith.constant 0 : index
    %c0_7 = arith.constant 0 : index
    %8 = vector.load %arg7[%c0_6, %c0_7] : memref<512x64xf32, #tpu.memory_space<vmem>>, vector<512x64xf32>
    tpu.vector_store %arg7[%c0_6, %c0_7], %7 {strides = array<i32>} : memref<512x64xf32, #tpu.memory_space<vmem>>, vector<512x64xf32>,
    %c0_i32_8 = arith.constant 0 : i32
    %9 = arith.cmpi eq, %arg2, %c0_i32_8 : i32
    %10 = arith.extui %9 : i1 to i32
    %c0_i32_9 = arith.constant 0 : i32
    %11 = arith.cmpi ne, %10, %c0_i32_9 : i32
    scf.if %11 {
      %c0_10 = arith.constant 0 : index
      %c0_11 = arith.constant 0 : index
      %12 = vector.load %arg7[%c0_10, %c0_11] : memref<512x64xf32, #tpu.memory_space<vmem>>, vector<512x64xf32>
      %13 = arith.truncf %12 : vector<512x64xf32> to vector<512x64xbf16>
      %c0_12 = arith.constant 0 : index
      %c0_13 = arith.constant 0 : index
      %14 = vector.load %arg5[%c0_12, %c0_13] : memref<512x64xbf16, #tpu.memory_space<vmem>>, vector<512x64xbf16>
      tpu.vector_store %arg5[%c0_12, %c0_13], %13 {strides = array<i32>} : memref<512x64xbf16, #tpu.memory_space<vmem>>, vector<512x64xbf16>,
      %cst_14 = arith.constant dense<0.000000e+00> : vector<64xf32>
      %15 = vector.multi_reduction <add>, %12, %cst_14 [0] : vector<512x64xf32> to vector<64xf32>
      %16 = arith.mulf %12, %12 : vector<512x64xf32>
      %cst_15 = arith.constant dense<0.000000e+00> : vector<64xf32>
      %17 = vector.multi_reduction <add>, %16, %cst_15 [0] : vector<512x64xf32> to vector<64xf32>
      %18 = vector.shape_cast %15 : vector<64xf32> to vector<1x64xf32>
      %19 = vector.shape_cast %17 : vector<64xf32> to vector<1x64xf32>
      %cst_16 = arith.constant 0.000000e+00 : f32
      %20 = vector.broadcast %cst_16 : f32 to vector<6x64xf32>
      %21 = tpu.concatenate %18, %19, %20 in 0 : vector<1x64xf32>, vector<1x64xf32>, vector<6x64xf32> -> vector<8x64xf32>
      %c0_17 = arith.constant 0 : index
      %c0_18 = arith.constant 0 : index
      %22 = vector.load %arg6[%c0_17, %c0_18] : memref<8x64xf32, #tpu.memory_space<vmem>>, vector<8x64xf32>
      tpu.vector_store %arg6[%c0_17, %c0_18], %21 {strides = array<i32>} : memref<8x64xf32, #tpu.memory_space<vmem>>, vector<8x64xf32>,
    } else {
    }
    return
  }
  func.func @transform_0(%arg0: i32, %arg1: i32, %arg2: i32) -> (i32, i32) {
    %c0_i32 = arith.constant 0 : i32
    return %arg0, %arg2 : i32, i32
  }
  func.func @transform_1(%arg0: i32, %arg1: i32, %arg2: i32) -> (i32, i32) {
    %c0_i32 = arith.constant 0 : i32
    return %arg2, %arg1 : i32, i32
  }
  func.func @transform_2(%arg0: i32, %arg1: i32, %arg2: i32) -> (i32, i32) {
    %c0_i32 = arith.constant 0 : i32
    return %arg0, %arg1 : i32, i32
  }
  func.func @transform_3(%arg0: i32, %arg1: i32, %arg2: i32) -> (i32, i32) {
    %c0_i32 = arith.constant 0 : i32
    return %arg0, %arg1 : i32, i32
  }
}

</mosaic_0001>

<bundles_post_ra>
// kernel: tpu_custom_call.1
= control target key start
LH: loop header
LB: loop body
LE: loop exit
PB: predicated region body
PF: predicated region fallthrough
CT: control target
= control target key end

     0   :  { %v2236_v1 = vmov 0   ;;  %vm576_vm0 = vcmask 154624   ;;  %vm673_vm1 = vcmask 1040384   ;;  %vm674_vm2 = vcmask 1041408   ;;  %s3404_s0 = inlined_call_operand.vmem [shape: bf16[512,147], index: 0, kind: input, shape index: {}]   ;;  %s3405_s1 = inlined_call_operand.vmem [shape: bf16[147,64], index: 1, kind: input, shape index: {}]   ;;  %s3406_s2 = inlined_call_operand.vmem [shape: bf16[512,64], index: 2, kind: output, shape index: {0}]   ;;  %s3407_s3 = inlined_call_operand.hbm [shape: f32[8,64], index: 3, kind: output, shape index: {1}]  }
   0x1   :  { %v2095_v0 = vld [vmem:[%s3405_s1] sm:$0xff]   ;;  %680 = vmatprep.subr.bf16.mxu0 %v2236_v1  ;;  %2071 = vmatprep.subr.bf16.mxu1 %v2236_v1  ;;  %v2096_v2 = vld [vmem:[%s3405_s1 + $0x8] sm:$0xff]   ;;  %v2097_v3 = vld [vmem:[%s3405_s1 + $0x10] sm:$0xff]   ;;  %v2237_v11 = vmov 65535   ;;  %vm19_vm3 = vcmask 523264   ;;  %v2238_v17 = vmov 0.0  }
   0x2   :  { %681 = vmatpush1.bf16.msra.mxu0 %v2095_v0  ;;  %2081 = vmatpush1.bf16.msra.mxu1 %v2095_v0  ;;  %v2098_v4 = vld [vmem:[%s3405_s1 + $0x18] sm:$0xff]   ;;  %v2107_v5 = vld [vmem:[%s3404_s0 + $0x4] ss:$8 sps:$4 sm:$0xff]   ;;  %v2101_v9 = vld [vmem:[%s3405_s1 + $0x30] sm:$0xff]   ;;  %v675_v12 = vsel %vm673_vm1, 4294967295, %v2237_v11  ;;  %20 = vst.msk [vmem:[#allocation2] sm:$0xff] %vm19_vm3, %v2238_v17 }
   0x3   :  { %682 = vmatprep.subr.bf16.mxu0 %v2236_v1  ;;  %2072 = vmatprep.subr.bf16.mxu1 %v2236_v1  ;;  %v2099_v6 = vld [vmem:[%s3405_s1 + $0x20] sm:$0xff]   ;;  %v2100_v7 = vld [vmem:[%s3405_s1 + $0x28] sm:$0xff]   ;;  %v2102_v10 = vld [vmem:[%s3405_s1 + $0x38] sm:$0xff]   ;;  %v676_v15 = vsel %vm674_vm2, %v675_v12, 0  ;;  %21 = vst.msk [vmem:[#allocation2 + $0x8] sm:$0xff] %vm19_vm3, %v2238_v17 }
   0x4   :  { %1911 = vmatprep.mubr.msk.bf16.mxu0 %vm576_vm0, %v2107_v5  ;;  %v2131_v8 = vld [vmem:[%s3404_s0 + $0x104] ss:$8 sps:$4 sm:$0xff]   ;;  %v2104_v14 = vld [vmem:[%s3405_s1 + $0x48] ss:$0 sps:$4 sm:$0x33]   ;;  %22 = vst.msk [vmem:[#allocation2 + $0x10] sm:$0xff] %vm19_vm3, %v2238_v17 }
   0x5   :  { %1927 = vmatprep.mubr.msk.bf16.mxu1 %vm576_vm0, %v2131_v8  ;;  %v2103_v13 = vld [vmem:[%s3405_s1 + $0x40] sm:$0xff]   ;;  %v2300_v16 = vand.u32 %v2104_v14, %v676_v15  ;;  %23 = vst.msk [vmem:[#allocation2 + $0x18] sm:$0xff] %vm19_vm3, %v2238_v17  ;;  %24 = vst.msk [vmem:[#allocation2 + $0x20] sm:$0xff] %vm19_vm3, %v2238_v17  ;;  %v2108_v20 = vld [vmem:[%s3404_s0 + $0x14] ss:$8 sps:$4 sm:$0xff]  }
   0x6   :  { %683 = vmatpush1.bf16.msra.mxu0 %v2096_v2  ;;  %2082 = vmatpush1.bf16.msra.mxu1 %v2096_v2  ;;  %25 = vst.msk [vmem:[#allocation2 + $0x28] sm:$0xff] %vm19_vm3, %v2238_v17  ;;  %26 = vst.msk [vmem:[#allocation2 + $0x30] sm:$0xff] %vm19_vm3, %v2238_v17  ;;  %v2105_v18 = vld [vmem:[%s3404_s0] ss:$8 sps:$4 sm:$0xff]   ;;  %v2135_v21 = vld [vmem:[%s3404_s0 + $0x114] ss:$8 sps:$4 sm:$0xff]  }
   0x7   :  { %684 = vmatprep.subr.bf16.mxu0 %v2236_v1  ;;  %2073 = vmatprep.subr.bf16.mxu1 %v2236_v1  ;;  %27 = vst.msk [vmem:[#allocation2 + $0x38] sm:$0xff] %vm19_vm3, %v2238_v17  ;;  %28 = vst.msk [vmem:[#allocation2 + $0x40] sm:$0xff] %vm19_vm3, %v2238_v17  ;;  %v2129_v19 = vld [vmem:[%s3404_s0 + $0x100] ss:$8 sps:$4 sm:$0xff]   ;;  %v2110_v22 = vld [vmem:[%s3404_s0 + $0x10] ss:$8 sps:$4 sm:$0xff]  }
   0x8   :  { %29 = vst.msk [vmem:[#allocation2 + $0x48] sm:$0xff] %vm19_vm3, %v2238_v17  ;;  %30 = vst.msk [vmem:[#allocation2 + $0x50] sm:$0xff] %vm19_vm3, %v2238_v17  ;;  %v2137_v23 = vld [vmem:[%s3404_s0 + $0x110] ss:$8 sps:$4 sm:$0xff]   ;;  %v2111_v24 = vld [vmem:[%s3404_s0 + $0x24] ss:$8 sps:$4 sm:$0xff]  }
   0x9   :  { %31 = vst.msk [vmem:[#allocation2 + $0x58] sm:$0xff] %vm19_vm3, %v2238_v17  ;;  %32 = vst.msk [vmem:[#allocation2 + $0x60] sm:$0xff] %vm19_vm3, %v2238_v17  ;;  %v2141_v25 = vld [vmem:[%s3404_s0 + $0x124] ss:$8 sps:$4 sm:$0xff]  }
   0xa   :  { %685 = vmatpush1.bf16.msra.mxu0 %v2097_v3  ;;  %2083 = vmatpush1.bf16.msra.mxu1 %v2097_v3  ;;  %33 = vst.msk [vmem:[#allocation2 + $0x68] sm:$0xff] %vm19_vm3, %v2238_v17  ;;  %34 = vst.msk [vmem:[#allocation2 + $0x70] sm:$0xff] %vm19_vm3, %v2238_v17 }
   0xb   :  { %686 = vmatprep.subr.bf16.mxu0 %v2236_v1  ;;  %2074 = vmatprep.subr.bf16.mxu1 %v2236_v1  ;;  %35 = vst.msk [vmem:[#allocation2 + $0x78] sm:$0xff] %vm19_vm3, %v2238_v17  ;;  %36 = vst.msk [vmem:[#allocation2 + $0x80] sm:$0xff] %vm19_vm3, %v2238_v17 }
   0xc   :  { %37 = vst.msk [vmem:[#allocation2 + $0x88] sm:$0xff] %vm19_vm3, %v2238_v17  ;;  %38 = vst.msk [vmem:[#allocation2 + $0x90] sm:$0xff] %vm19_vm3, %v2238_v17 }
   0xd   :  { %39 = vst.msk [vmem:[#allocation2 + $0x98] sm:$0xff] %vm19_vm3, %v2238_v17  ;;  %40 = vst.msk [vmem:[#allocation2 + $0xa0] sm:$0xff] %vm19_vm3, %v2238_v17 }
   0xe   :  { %687 = vmatpush1.bf16.msra.mxu0 %v2098_v4  ;;  %2084 = vmatpush1.bf16.msra.mxu1 %v2098_v4  ;;  %41 = vst.msk [vmem:[#allocation2 + $0xa8] sm:$0xff] %vm19_vm3, %v2238_v17  ;;  %42 = vst.msk [vmem:[#allocation2 + $0xb0] sm:$0xff] %vm19_vm3, %v2238_v17 }
   0xf   :  { %688 = vmatprep.subr.bf16.mxu0 %v2236_v1  ;;  %2075 = vmatprep.subr.bf16.mxu1 %v2236_v1  ;;  %43 = vst.msk [vmem:[#allocation2 + $0xb8] sm:$0xff] %vm19_vm3, %v2238_v17  ;;  %44 = vst.msk [vmem:[#allocation2 + $0xc0] sm:$0xff] %vm19_vm3, %v2238_v17 }
  0x10   :  { %45 = vst.msk [vmem:[#allocation2 + $0xc8] sm:$0xff] %vm19_vm3, %v2238_v17  ;;  %46 = vst.msk [vmem:[#allocation2 + $0xd0] sm:$0xff] %vm19_vm3, %v2238_v17 }
  0x11   :  { %47 = vst.msk [vmem:[#allocation2 + $0xd8] sm:$0xff] %vm19_vm3, %v2238_v17  ;;  %48 = vst.msk [vmem:[#allocation2 + $0xe0] sm:$0xff] %vm19_vm3, %v2238_v17 }
  0x12   :  { %689 = vmatpush1.bf16.msra.mxu0 %v2099_v6  ;;  %2085 = vmatpush1.bf16.msra.mxu1 %v2099_v6  ;;  %49 = vst.msk [vmem:[#allocation2 + $0xe8] sm:$0xff] %vm19_vm3, %v2238_v17  ;;  %50 = vst.msk [vmem:[#allocation2 + $0xf0] sm:$0xff] %vm19_vm3, %v2238_v17 }
  0x13   :  { %690 = vmatprep.subr.bf16.mxu0 %v2236_v1  ;;  %2076 = vmatprep.subr.bf16.mxu1 %v2236_v1  ;;  %51 = vst.msk [vmem:[#allocation2 + $0xf8] sm:$0xff] %vm19_vm3, %v2238_v17  ;;  %52 = vst.msk [vmem:[#allocation2 + $0x100] sm:$0xff] %vm19_vm3, %v2238_v17 }
  0x14   :  { %53 = vst.msk [vmem:[#allocation2 + $0x108] sm:$0xff] %vm19_vm3, %v2238_v17  ;;  %54 = vst.msk [vmem:[#allocation2 + $0x110] sm:$0xff] %vm19_vm3, %v2238_v17 }
  0x15   :  { %55 = vst.msk [vmem:[#allocation2 + $0x118] sm:$0xff] %vm19_vm3, %v2238_v17  ;;  %56 = vst.msk [vmem:[#allocation2 + $0x120] sm:$0xff] %vm19_vm3, %v2238_v17 }
  0x16   :  { %691 = vmatpush1.bf16.msra.mxu0 %v2100_v7  ;;  %2086 = vmatpush1.bf16.msra.mxu1 %v2100_v7  ;;  %57 = vst.msk [vmem:[#allocation2 + $0x128] sm:$0xff] %vm19_vm3, %v2238_v17  ;;  %58 = vst.msk [vmem:[#allocation2 + $0x130] sm:$0xff] %vm19_vm3, %v2238_v17 }
  0x17   :  { %692 = vmatprep.subr.bf16.mxu0 %v2236_v1  ;;  %2077 = vmatprep.subr.bf16.mxu1 %v2236_v1  ;;  %59 = vst.msk [vmem:[#allocation2 + $0x138] sm:$0xff] %vm19_vm3, %v2238_v17  ;;  %60 = vst.msk [vmem:[#allocation2 + $0x140] sm:$0xff] %vm19_vm3, %v2238_v17 }
  0x18   :  { %61 = vst.msk [vmem:[#allocation2 + $0x148] sm:$0xff] %vm19_vm3, %v2238_v17  ;;  %62 = vst.msk [vmem:[#allocation2 + $0x150] sm:$0xff] %vm19_vm3, %v2238_v17 }
  0x19   :  { %63 = vst.msk [vmem:[#allocation2 + $0x158] sm:$0xff] %vm19_vm3, %v2238_v17  ;;  %64 = vst.msk [vmem:[#allocation2 + $0x160] sm:$0xff] %vm19_vm3, %v2238_v17 }
  0x1a   :  { %693 = vmatpush1.bf16.msra.mxu0 %v2101_v9  ;;  %2087 = vmatpush1.bf16.msra.mxu1 %v2101_v9  ;;  %65 = vst.msk [vmem:[#allocation2 + $0x168] sm:$0xff] %vm19_vm3, %v2238_v17  ;;  %66 = vst.msk [vmem:[#allocation2 + $0x170] sm:$0xff] %vm19_vm3, %v2238_v17 }
  0x1b   :  { %694 = vmatprep.subr.bf16.mxu0 %v2236_v1  ;;  %2078 = vmatprep.subr.bf16.mxu1 %v2236_v1  ;;  %67 = vst.msk [vmem:[#allocation2 + $0x178] sm:$0xff] %vm19_vm3, %v2238_v17  ;;  %68 = vst.msk [vmem:[#allocation2 + $0x180] sm:$0xff] %vm19_vm3, %v2238_v17 }
  0x1c   :  { %69 = vst.msk [vmem:[#allocation2 + $0x188] sm:$0xff] %vm19_vm3, %v2238_v17  ;;  %70 = vst.msk [vmem:[#allocation2 + $0x190] sm:$0xff] %vm19_vm3, %v2238_v17 }
  0x1d   :  { %71 = vst.msk [vmem:[#allocation2 + $0x198] sm:$0xff] %vm19_vm3, %v2238_v17  ;;  %72 = vst.msk [vmem:[#allocation2 + $0x1a0] sm:$0xff] %vm19_vm3, %v2238_v17 }
  0x1e   :  { %695 = vmatpush1.bf16.msra.mxu0 %v2102_v10  ;;  %2088 = vmatpush1.bf16.msra.mxu1 %v2102_v10  ;;  %73 = vst.msk [vmem:[#allocation2 + $0x1a8] sm:$0xff] %vm19_vm3, %v2238_v17  ;;  %74 = vst.msk [vmem:[#allocation2 + $0x1b0] sm:$0xff] %vm19_vm3, %v2238_v17 }
  0x1f   :  { %696 = vmatprep.subr.bf16.mxu0 %v2236_v1  ;;  %2079 = vmatprep.subr.bf16.mxu1 %v2236_v1  ;;  %75 = vst.msk [vmem:[#allocation2 + $0x1b8] sm:$0xff] %vm19_vm3, %v2238_v17  ;;  %76 = vst.msk [vmem:[#allocation2 + $0x1c0] sm:$0xff] %vm19_vm3, %v2238_v17 }
  0x20   :  { %77 = vst.msk [vmem:[#allocation2 + $0x1c8] sm:$0xff] %vm19_vm3, %v2238_v17  ;;  %78 = vst.msk [vmem:[#allocation2 + $0x1d0] sm:$0xff] %vm19_vm3, %v2238_v17 }
  0x21   :  { %79 = vst.msk [vmem:[#allocation2 + $0x1d8] sm:$0xff] %vm19_vm3, %v2238_v17  ;;  %80 = vst.msk [vmem:[#allocation2 + $0x1e0] sm:$0xff] %vm19_vm3, %v2238_v17 }
  0x22   :  { %697 = vmatpush1.bf16.msra.mxu0 %v2103_v13  ;;  %2089 = vmatpush1.bf16.msra.mxu1 %v2103_v13  ;;  %81 = vst.msk [vmem:[#allocation2 + $0x1e8] sm:$0xff] %vm19_vm3, %v2238_v17  ;;  %82 = vst.msk [vmem:[#allocation2 + $0x1f0] sm:$0xff] %vm19_vm3, %v2238_v17 }
  0x23   :  { %698 = vmatprep.subr.bf16.mxu0 %v2236_v1  ;;  %2080 = vmatprep.subr.bf16.mxu1 %v2236_v1  ;;  %83 = vst.msk [vmem:[#allocation2 + $0x1f8] sm:$0xff] %vm19_vm3, %v2238_v17 }
  0x26   :  { %699 = vmatpush1.bf16.msra.mxu0 %v2300_v16  ;;  %2090 = vmatpush1.bf16.msra.mxu1 %v2300_v16 }
  0x29   :  { %713 = vmatmul.mubr.bf16.vlgmr.msra.gmra.mrb[0].mxu0 %v2105_v18  ;;  %841 = vmatmul.mubr.bf16.vlgmr.msra.gmra.mrb[0].mxu1 %v2129_v19 }
  0x2a   :  { %1912 = vmatprep.mubr.msk.bf16.mxu0 %vm576_vm0, %v2108_v20  ;;  %1928 = vmatprep.mubr.msk.bf16.mxu1 %vm576_vm0, %v2135_v21 }
  0x31   :  { %721 = vmatmul.mubr.bf16.gmra.mrb[4].mxu0 %v2110_v22  ;;  %849 = vmatmul.mubr.bf16.gmra.mrb[4].mxu1 %v2137_v23 }
  0x32   :  { %1913 = vmatprep.mubr.msk.bf16.mxu0 %vm576_vm0, %v2111_v24  ;;  %1929 = vmatprep.mubr.msk.bf16.mxu1 %vm576_vm0, %v2141_v25 }
  0x33   :  { %9 = vsyncpa [#allocation4], 0  ;;  %v2113_v26 = vld [vmem:[%s3404_s0 + $0x20] ss:$8 sps:$4 sm:$0xff]   ;;  %v2114_v28 = vld [vmem:[%s3404_s0 + $0x34] ss:$8 sps:$4 sm:$0xff]  }
  0x34   :  { %v2143_v27 = vld [vmem:[%s3404_s0 + $0x120] ss:$8 sps:$4 sm:$0xff]   ;;  %v2147_v29 = vld [vmem:[%s3404_s0 + $0x134] ss:$8 sps:$4 sm:$0xff]   ;;  %v2116_v30 = vld [vmem:[%s3404_s0 + $0x30] ss:$8 sps:$4 sm:$0xff]  }
  0x35   :  { %v2149_v31 = vld [vmem:[%s3404_s0 + $0x130] ss:$8 sps:$4 sm:$0xff]   ;;  %v2117_v32 = vld [vmem:[%s3404_s0 + $0x44] ss:$8 sps:$4 sm:$0xff]   ;;  %v2119_v34 = vld [vmem:[%s3404_s0 + $0x40] ss:$8 sps:$4 sm:$0xff]  }
  0x36   :  { %v2153_v33 = vld [vmem:[%s3404_s0 + $0x144] ss:$8 sps:$4 sm:$0xff]   ;;  %v2155_v35 = vld [vmem:[%s3404_s0 + $0x140] ss:$8 sps:$4 sm:$0xff]   ;;  %v2120_v36 = vld [vmem:[%s3404_s0 + $0x54] ss:$8 sps:$4 sm:$0xff]  }
  0x37   :  { %v2159_v37 = vld [vmem:[%s3404_s0 + $0x154] ss:$8 sps:$4 sm:$0xff]   ;;  %v2122_v38 = vld [vmem:[%s3404_s0 + $0x50] ss:$8 sps:$4 sm:$0xff]   ;;  %v2123_v40 = vld [vmem:[%s3404_s0 + $0x64] ss:$8 sps:$4 sm:$0xff]  }
  0x38   :  { %v2161_v39 = vld [vmem:[%s3404_s0 + $0x150] ss:$8 sps:$4 sm:$0xff]   ;;  %v2165_v41 = vld [vmem:[%s3404_s0 + $0x164] ss:$8 sps:$4 sm:$0xff]   ;;  %v2125_v42 = vld [vmem:[%s3404_s0 + $0x60] ss:$8 sps:$4 sm:$0xff]  }
  0x39   :  { %729 = vmatmul.mubr.bf16.gmra.mrb[8].mxu0 %v2113_v26  ;;  %857 = vmatmul.mubr.bf16.gmra.mrb[8].mxu1 %v2143_v27  ;;  %v2167_v43 = vld [vmem:[%s3404_s0 + $0x160] ss:$8 sps:$4 sm:$0xff]   ;;  %v2126_v44 = vld [vmem:[%s3404_s0 + $0x74] ss:$8 sps:$4 sm:$0xff]   ;;  %v2128_v46 = vld [vmem:[%s3404_s0 + $0x70] ss:$8 sps:$4 sm:$0xff]  }
  0x3a   :  { %1914 = vmatprep.mubr.msk.bf16.mxu0 %vm576_vm0, %v2114_v28  ;;  %1930 = vmatprep.mubr.msk.bf16.mxu1 %vm576_vm0, %v2147_v29  ;;  %v2171_v45 = vld [vmem:[%s3404_s0 + $0x174] ss:$8 sps:$4 sm:$0xff]   ;;  %v2173_v47 = vld [vmem:[%s3404_s0 + $0x170] ss:$8 sps:$4 sm:$0xff]   ;;  %v2132_v48 = vld [vmem:[%s3404_s0 + $0x84] ss:$8 sps:$4 sm:$0xff]  }
  0x3b   :  { %v2177_v49 = vld [vmem:[%s3404_s0 + $0x184] ss:$8 sps:$4 sm:$0xff]   ;;  %v2134_v50 = vld [vmem:[%s3404_s0 + $0x80] ss:$8 sps:$4 sm:$0xff]   ;;  %v2138_v52 = vld [vmem:[%s3404_s0 + $0x94] ss:$8 sps:$4 sm:$0xff]  }
  0x3c   :  { %v2179_v51 = vld [vmem:[%s3404_s0 + $0x180] ss:$8 sps:$4 sm:$0xff]   ;;  %v2180_v53 = vld [vmem:[%s3404_s0 + $0x194] ss:$8 sps:$4 sm:$0xff]   ;;  %v2140_v54 = vld [vmem:[%s3404_s0 + $0x90] ss:$8 sps:$4 sm:$0xff]  }
  0x3d   :  { %v2182_v55 = vld [vmem:[%s3404_s0 + $0x190] ss:$8 sps:$4 sm:$0xff]   ;;  %v2144_v56 = vld [vmem:[%s3404_s0 + $0xa4] ss:$8 sps:$4 sm:$0xff]   ;;  %v2146_v58 = vld [vmem:[%s3404_s0 + $0xa0] ss:$8 sps:$4 sm:$0xff]  }
  0x3e   :  { %v2183_v57 = vld [vmem:[%s3404_s0 + $0x1a4] ss:$8 sps:$4 sm:$0xff]   ;;  %v2185_v59 = vld [vmem:[%s3404_s0 + $0x1a0] ss:$8 sps:$4 sm:$0xff]   ;;  %v2150_v60 = vld [vmem:[%s3404_s0 + $0xb4] ss:$8 sps:$4 sm:$0xff]  }
  0x3f   :  { %v2186_v61 = vld [vmem:[%s3404_s0 + $0x1b4] ss:$8 sps:$4 sm:$0xff]   ;;  %v2152_v62 = vld [vmem:[%s3404_s0 + $0xb0] ss:$8 sps:$4 sm:$0xff]   ;;  %v2156_v0 = vld [vmem:[%s3404_s0 + $0xc4] ss:$8 sps:$4 sm:$0xff]  }
  0x40   :  { %v2188_v63 = vld [vmem:[%s3404_s0 + $0x1b0] ss:$8 sps:$4 sm:$0xff]   ;;  %v2189_v1 = vld [vmem:[%s3404_s0 + $0x1c4] ss:$8 sps:$4 sm:$0xff]   ;;  %v2158_v2 = vld [vmem:[%s3404_s0 + $0xc0] ss:$8 sps:$4 sm:$0xff]  }
  0x41   :  { %737 = vmatmul.mubr.bf16.gmra.mrb[12].mxu0 %v2116_v30  ;;  %865 = vmatmul.mubr.bf16.gmra.mrb[12].mxu1 %v2149_v31  ;;  %v2191_v3 = vld [vmem:[%s3404_s0 + $0x1c0] ss:$8 sps:$4 sm:$0xff]   ;;  %v2162_v4 = vld [vmem:[%s3404_s0 + $0xd4] ss:$8 sps:$4 sm:$0xff]   ;;  %v2164_v6 = vld [vmem:[%s3404_s0 + $0xd0] ss:$8 sps:$4 sm:$0xff]  }
  0x42   :  { %1915 = vmatprep.mubr.msk.bf16.mxu0 %vm576_vm0, %v2117_v32  ;;  %1931 = vmatprep.mubr.msk.bf16.mxu1 %vm576_vm0, %v2153_v33  ;;  %v2192_v5 = vld [vmem:[%s3404_s0 + $0x1d4] ss:$8 sps:$4 sm:$0xff]   ;;  %v2194_v7 = vld [vmem:[%s3404_s0 + $0x1d0] ss:$8 sps:$4 sm:$0xff]   ;;  %v2168_v8 = vld [vmem:[%s3404_s0 + $0xe4] ss:$8 sps:$4 sm:$0xff]  }
  0x43   :  { %v2195_v9 = vld [vmem:[%s3404_s0 + $0x1e4] ss:$8 sps:$4 sm:$0xff]   ;;  %v2170_v10 = vld [vmem:[%s3404_s0 + $0xe0] ss:$8 sps:$4 sm:$0xff]   ;;  %v2174_v12 = vld [vmem:[%s3404_s0 + $0xf4] ss:$8 sps:$4 sm:$0xff]  }
  0x44   :  { %v2197_v11 = vld [vmem:[%s3404_s0 + $0x1e0] ss:$8 sps:$4 sm:$0xff]   ;;  %v2198_v13 = vld [vmem:[%s3404_s0 + $0x1f4] ss:$8 sps:$4 sm:$0xff]   ;;  %v2176_v14 = vld [vmem:[%s3404_s0 + $0xf0] ss:$8 sps:$4 sm:$0xff]  }
  0x45   :  { %v2200_v15 = vld [vmem:[%s3404_s0 + $0x1f0] ss:$8 sps:$4 sm:$0xff]   ;;  %v84_v16 = vld [vmem:[#allocation2] sm:$0xff]  ;;  %v85_v19 = vld [vmem:[#allocation2 + $0x8] sm:$0xff]  ;;  %vm1421_vm4 = vcmask 519168  }
  0x46   :  { %v116_v17 = vld [vmem:[#allocation2 + $0x100] sm:$0xff]  ;;  %v117_v21 = vld [vmem:[#allocation2 + $0x108] sm:$0xff]  ;;  %v86_v32 = vld [vmem:[#allocation2 + $0x10] sm:$0xff] }
  0x47   :  { %v118_v33 = vld [vmem:[#allocation2 + $0x110] sm:$0xff] }
  0x49   :  { %745 = vmatmul.mubr.bf16.gmra.mrb[16].mxu0 %v2119_v34  ;;  %873 = vmatmul.mubr.bf16.gmra.mrb[16].mxu1 %v2155_v35  ;;  %v87_v35 = vld [vmem:[#allocation2 + $0x18] sm:$0xff] }
  0x4a   :  { %1916 = vmatprep.mubr.msk.bf16.mxu0 %vm576_vm0, %v2120_v36  ;;  %1932 = vmatprep.mubr.msk.bf16.mxu1 %vm576_vm0, %v2159_v37 }
  0x51   :  { %753 = vmatmul.mubr.bf16.gmra.mrb[20].mxu0 %v2122_v38  ;;  %881 = vmatmul.mubr.bf16.gmra.mrb[20].mxu1 %v2161_v39 }
  0x52   :  { %1917 = vmatprep.mubr.msk.bf16.mxu0 %vm576_vm0, %v2123_v40  ;;  %1933 = vmatprep.mubr.msk.bf16.mxu1 %vm576_vm0, %v2165_v41  ;;  %v119_v41 = vld [vmem:[#allocation2 + $0x118] sm:$0xff] }
  0x59   :  { %761 = vmatmul.mubr.bf16.gmra.mrb[24].mxu0 %v2125_v42  ;;  %889 = vmatmul.mubr.bf16.gmra.mrb[24].mxu1 %v2167_v43 }
  0x5a   :  { %1918 = vmatprep.mubr.msk.bf16.mxu0 %vm576_vm0, %v2126_v44  ;;  %1934 = vmatprep.mubr.msk.bf16.mxu1 %vm576_vm0, %v2171_v45 }
  0x61   :  { %769 = vmatmul.mubr.bf16.gmra.mrb[28].mxu0 %v2128_v46  ;;  %897 = vmatmul.mubr.bf16.gmra.mrb[28].mxu1 %v2173_v47 }
  0x62   :  { %1919 = vmatprep.mubr.msk.bf16.mxu0 %vm576_vm0, %v2132_v48  ;;  %1935 = vmatprep.mubr.msk.bf16.mxu1 %vm576_vm0, %v2177_v49 }
  0x69   :  { %777 = vmatmul.mubr.bf16.gmra.mrb[32].mxu0 %v2134_v50  ;;  %905 = vmatmul.mubr.bf16.gmra.mrb[32].mxu1 %v2179_v51 }
  0x6a   :  { %1920 = vmatprep.mubr.msk.bf16.mxu0 %vm576_vm0, %v2138_v52  ;;  %1936 = vmatprep.mubr.msk.bf16.mxu1 %vm576_vm0, %v2180_v53 }
  0x71   :  { %785 = vmatmul.mubr.bf16.gmra.mrb[36].mxu0 %v2140_v54  ;;  %913 = vmatmul.mubr.bf16.gmra.mrb[36].mxu1 %v2182_v55  ;;  %v88_v55 = vld [vmem:[#allocation2 + $0x20] sm:$0xff] }
  0x72   :  { %1921 = vmatprep.mubr.msk.bf16.mxu0 %vm576_vm0, %v2144_v56  ;;  %1937 = vmatprep.mubr.msk.bf16.mxu1 %vm576_vm0, %v2183_v57  ;;  %v120_v57 = vld [vmem:[#allocation2 + $0x120] sm:$0xff] }
  0x79   :  { %793 = vmatmul.mubr.bf16.gmra.mrb[40].mxu0 %v2146_v58  ;;  %921 = vmatmul.mubr.bf16.gmra.mrb[40].mxu1 %v2185_v59  ;;  %v89_v59 = vld [vmem:[#allocation2 + $0x28] sm:$0xff] }
  0x7a   :  { %1922 = vmatprep.mubr.msk.bf16.mxu0 %vm576_vm0, %v2150_v60  ;;  %1938 = vmatprep.mubr.msk.bf16.mxu1 %vm576_vm0, %v2186_v61 }
  0x81   :  { %801 = vmatmul.mubr.bf16.gmra.mrb[44].mxu0 %v2152_v62  ;;  %929 = vmatmul.mubr.bf16.gmra.mrb[44].mxu1 %v2188_v63 }
  0x82   :  { %1923 = vmatprep.mubr.msk.bf16.mxu0 %vm576_vm0, %v2156_v0  ;;  %1939 = vmatprep.mubr.msk.bf16.mxu1 %vm576_vm0, %v2189_v1 }
  0x89   :  { %809 = vmatmul.mubr.bf16.gmra.mrb[48].mxu0 %v2158_v2  ;;  %937 = vmatmul.mubr.bf16.gmra.mrb[48].mxu1 %v2191_v3 }
  0x8a   :  { %1924 = vmatprep.mubr.msk.bf16.mxu0 %vm576_vm0, %v2162_v4  ;;  %1940 = vmatprep.mubr.msk.bf16.mxu1 %vm576_vm0, %v2192_v5 }
  0x91   :  { %817 = vmatmul.mubr.bf16.gmra.mrb[52].mxu0 %v2164_v6  ;;  %945 = vmatmul.mubr.bf16.gmra.mrb[52].mxu1 %v2194_v7 }
  0x92   :  { %1925 = vmatprep.mubr.msk.bf16.mxu0 %vm576_vm0, %v2168_v8  ;;  %1941 = vmatprep.mubr.msk.bf16.mxu1 %vm576_vm0, %v2195_v9 }
  0x99   :  { %825 = vmatmul.mubr.bf16.gmra.mrb[56].mxu0 %v2170_v10  ;;  %953 = vmatmul.mubr.bf16.gmra.mrb[56].mxu1 %v2197_v11  ;;  %v121_v11 = vld [vmem:[#allocation2 + $0x128] sm:$0xff] }
  0x9a   :  { %1926 = vmatprep.mubr.msk.bf16.mxu0 %vm576_vm0, %v2174_v12  ;;  %1942 = vmatprep.mubr.msk.bf16.mxu1 %vm576_vm0, %v2198_v13 }
  0xa1   :  { %833 = vmatmul.mubr.bf16.gmra.mrb[60].mxu0 %v2176_v14  ;;  %961 = vmatmul.mubr.bf16.gmra.mrb[60].mxu1 %v2200_v15  ;;  %v90_v14 = vld [vmem:[#allocation2 + $0x30] sm:$0xff] }
  0xfc   :  { %v714_v18 = vpop.f32.mrb[0].mxu0  ;;  %v842_v20 = vpop.f32.mrb[0].mxu1 }
  0xfd   :  { %v969_v22 = vadd.f32 %v714_v18, %v84_v16  ;;  %v716_v23 = vpop.f32.mrb[1].mxu0  ;;  %v1001_v24 = vadd.f32 %v842_v20, %v116_v17  ;;  %v844_v25 = vpop.f32.mrb[1].mxu1  ;;  %v122_v16 = vld [vmem:[#allocation2 + $0x130] sm:$0xff] }
  0xfe   :  { %v717_v26 = vpop.f32.mrb[2].mxu0  ;;  %v845_v27 = vpop.f32.mrb[2].mxu1 }
  0xff   :  { %1034 = vst.msk [vmem:[#allocation2] sm:$0xff] %vm19_vm3, %v969_v22  ;;  %v970_v28 = vadd.f32 %v717_v26, %v85_v19  ;;  %v719_v29 = vpop.f32.mrb[3].mxu0  ;;  %1066 = vst.msk [vmem:[#allocation2 + $0x100] sm:$0xff] %vm19_vm3, %v1001_v24  ;;  %v1002_v30 = vadd.f32 %v845_v27, %v117_v21  ;;  %v847_v31 = vpop.f32.mrb[3].mxu1  ;;  %v91_v19 = vld [vmem:[#allocation2 + $0x38] sm:$0xff] }
 0x101   :  { %1035 = vst.msk [vmem:[#allocation2 + $0x8] sm:$0xff] %vm19_vm3, %v970_v28  ;;  %1067 = vst.msk [vmem:[#allocation2 + $0x108] sm:$0xff] %vm19_vm3, %v1002_v30 }
 0x104   :  { %v722_v34 = vpop.f32.mrb[4].mxu0  ;;  %v850_v36 = vpop.f32.mrb[4].mxu1 }
 0x105   :  { %v971_v37 = vadd.f32 %v722_v34, %v86_v32  ;;  %v724_v38 = vpop.f32.mrb[5].mxu0  ;;  %v1003_v39 = vadd.f32 %v850_v36, %v118_v33  ;;  %v852_v40 = vpop.f32.mrb[5].mxu1  ;;  %v123_v32 = vld [vmem:[#allocation2 + $0x138] sm:$0xff] }
 0x106   :  { %v2652_v42 = vld [vmem:[#allocation2] sm:$0xff]  ;;  %v725_v43 = vpop.f32.mrb[6].mxu0  ;;  %v853_v45 = vpop.f32.mrb[6].mxu1 }
 0x107   :  { %v1133_v44 = vld [vmem:[#allocation2 + $0x100] sm:$0xff]  ;;  %v2007_v46 = vpack.c.bf16 %v2652_v42, %v2652_v42  ;;  %1036 = vst.msk [vmem:[#allocation2 + $0x10] sm:$0xff] %vm19_vm3, %v971_v37  ;;  %v972_v47 = vadd.f32 %v725_v43, %v87_v35  ;;  %v727_v48 = vpop.f32.mrb[7].mxu0  ;;  %1068 = vst.msk [vmem:[#allocation2 + $0x110] sm:$0xff] %vm19_vm3, %v1003_v39  ;;  %v855_v49 = vpop.f32.mrb[7].mxu1  ;;  %v1004_v53 = vadd.f32 %v853_v45, %v119_v41  ;;  %v93_v41 = vld [vmem:[#allocation2 + $0x48] sm:$0xff] }
 0x108   :  { %v2658_v50 = vld [vmem:[#allocation2 + $0x8] sm:$0xff]  ;;  %v2039_v51 = vpack.c.bf16 %v1133_v44, %v1133_v44  ;;  %v92_v37 = vld [vmem:[#allocation2 + $0x40] sm:$0xff] }
 0x109   :  { %v1134_v52 = vld [vmem:[#allocation2 + $0x108] sm:$0xff]  ;;  %1422 = vst.msk [vmem:[%s3406_s2] sm:$0xf] %vm1421_vm4, %v2007_v46  ;;  %v2008_v54 = vpack.c.bf16 %v2658_v50, %v2658_v50  ;;  %v124_v39 = vld [vmem:[#allocation2 + $0x140] sm:$0xff] }
 0x10a   :  { %1037 = vst.msk [vmem:[#allocation2 + $0x18] sm:$0xff] %vm19_vm3, %v972_v47  ;;  %v2040_v56 = vpack.c.bf16 %v1134_v52, %v1134_v52  ;;  %1069 = vst.msk [vmem:[#allocation2 + $0x118] sm:$0xff] %vm19_vm3, %v1004_v53 }
 0x10b   :  { %1454 = vst.msk [vmem:[%s3406_s2 + $0x80] sm:$0xf] %vm1421_vm4, %v2039_v51  ;;  %1423 = vst.msk [vmem:[%s3406_s2 + $0x4] sm:$0xf] %vm1421_vm4, %v2008_v54 }
 0x10c   :  { %v730_v58 = vpop.f32.mrb[8].mxu0  ;;  %1455 = vst.msk [vmem:[%s3406_s2 + $0x84] sm:$0xf] %vm1421_vm4, %v2040_v56  ;;  %v858_v60 = vpop.f32.mrb[8].mxu1 }
 0x10d   :  { %v973_v61 = vadd.f32 %v730_v58, %v88_v55  ;;  %v732_v62 = vpop.f32.mrb[9].mxu0  ;;  %v1005_v63 = vadd.f32 %v858_v60, %v120_v57  ;;  %v860_v0 = vpop.f32.mrb[9].mxu1  ;;  %v125_v58 = vld [vmem:[#allocation2 + $0x148] sm:$0xff] }
 0x10e   :  { %v2680_v1 = vld [vmem:[#allocation2 + $0x10] sm:$0xff]  ;;  %v733_v2 = vpop.f32.mrb[10].mxu0  ;;  %v861_v4 = vpop.f32.mrb[10].mxu1 }
 0x10f   :  { %v1135_v3 = vld [vmem:[#allocation2 + $0x110] sm:$0xff]  ;;  %v2009_v5 = vpack.c.bf16 %v2680_v1, %v2680_v1  ;;  %1038 = vst.msk [vmem:[#allocation2 + $0x20] sm:$0xff] %vm19_vm3, %v973_v61  ;;  %v974_v6 = vadd.f32 %v733_v2, %v89_v59  ;;  %v735_v7 = vpop.f32.mrb[11].mxu0  ;;  %1070 = vst.msk [vmem:[#allocation2 + $0x120] sm:$0xff] %vm19_vm3, %v1005_v63  ;;  %v863_v8 = vpop.f32.mrb[11].mxu1  ;;  %v1006_v17 = vadd.f32 %v861_v4, %v121_v11 }
 0x110   :  { %v2041_v10 = vpack.c.bf16 %v1135_v3, %v1135_v3  ;;  %v94_v63 = vld [vmem:[#allocation2 + $0x50] sm:$0xff]  ;;  %v1620_v8 = vmul.f32 %v2658_v50, %v2658_v50 }
 0x111   :  { %v2686_v9 = vld [vmem:[#allocation2 + $0x18] sm:$0xff]  ;;  %1424 = vst.msk [vmem:[%s3406_s2 + $0x8] sm:$0xf] %vm1421_vm4, %v2009_v5  ;;  %v126_v2 = vld [vmem:[#allocation2 + $0x150] sm:$0xff] }
 0x112   :  { %v2010_v12 = vpack.c.bf16 %v2686_v9, %v2686_v9  ;;  %1039 = vst.msk [vmem:[#allocation2 + $0x28] sm:$0xff] %vm19_vm3, %v974_v6  ;;  %v1136_v13 = vld [vmem:[#allocation2 + $0x118] sm:$0xff]  ;;  %1071 = vst.msk [vmem:[#allocation2 + $0x128] sm:$0xff] %vm19_vm3, %v1006_v17 }
 0x113   :  { %1456 = vst.msk [vmem:[%s3406_s2 + $0x88] sm:$0xf] %vm1421_vm4, %v2041_v10  ;;  %v2042_v15 = vpack.c.bf16 %v1136_v13, %v1136_v13  ;;  %v95_v5 = vld [vmem:[#allocation2 + $0x58] sm:$0xff] }
 0x114   :  { %1425 = vst.msk [vmem:[%s3406_s2 + $0xc] sm:$0xf] %vm1421_vm4, %v2010_v12  ;;  %v738_v18 = vpop.f32.mrb[12].mxu0  ;;  %v866_v20 = vpop.f32.mrb[12].mxu1 }
 0x115   :  { %1457 = vst.msk [vmem:[%s3406_s2 + $0x8c] sm:$0xf] %vm1421_vm4, %v2042_v15  ;;  %v975_v21 = vadd.f32 %v738_v18, %v90_v14  ;;  %v740_v22 = vpop.f32.mrb[13].mxu0  ;;  %v1007_v23 = vadd.f32 %v866_v20, %v122_v16  ;;  %v868_v24 = vpop.f32.mrb[13].mxu1  ;;  %v1619_v14 = vmul.f32 %v2652_v42, %v2652_v42  ;;  %v1487_v18 = vsel %vm19_vm3, %v2658_v50, 0.0 }
 0x116   :  { %v2708_v25 = vld [vmem:[#allocation2 + $0x20] sm:$0xff]  ;;  %v741_v26 = vpop.f32.mrb[14].mxu0  ;;  %v869_v28 = vpop.f32.mrb[14].mxu1  ;;  %v127_v24 = vld [vmem:[#allocation2 + $0x158] sm:$0xff]  ;;  %v1486_v50 = vsel %vm19_vm3, %v2652_v42, 0.0 }
 0x117   :  { %v1137_v27 = vld [vmem:[#allocation2 + $0x120] sm:$0xff]  ;;  %v2011_v29 = vpack.c.bf16 %v2708_v25, %v2708_v25  ;;  %1040 = vst.msk [vmem:[#allocation2 + $0x30] sm:$0xff] %vm19_vm3, %v975_v21  ;;  %v976_v30 = vadd.f32 %v741_v26, %v91_v19  ;;  %v743_v31 = vpop.f32.mrb[15].mxu0  ;;  %1072 = vst.msk [vmem:[#allocation2 + $0x130] sm:$0xff] %vm19_vm3, %v1007_v23  ;;  %v871_v33 = vpop.f32.mrb[15].mxu1  ;;  %v1008_v38 = vadd.f32 %v869_v28, %v123_v32 }
 0x118   :  { %v2043_v35 = vpack.c.bf16 %v1137_v27, %v1137_v27  ;;  %v1621_v19 = vmul.f32 %v2680_v1, %v2680_v1  ;;  %v1488_v32 = vadd.f32 %v1487_v18, %v1486_v50  ;;  %v96_v33 = vld [vmem:[#allocation2 + $0x60] sm:$0xff] }
 0x119   :  { %v2714_v34 = vld [vmem:[#allocation2 + $0x28] sm:$0xff]  ;;  %1426 = vst.msk [vmem:[%s3406_s2 + $0x10] sm:$0xf] %vm1421_vm4, %v2011_v29  ;;  %v1684_v29 = vsel %vm19_vm3, %v1620_v8, 0.0 }
 0x11a   :  { %v2012_v36 = vpack.c.bf16 %v2714_v34, %v2714_v34  ;;  %1041 = vst.msk [vmem:[#allocation2 + $0x38] sm:$0xff] %vm19_vm3, %v976_v30  ;;  %v1138_v43 = vld [vmem:[#allocation2 + $0x128] sm:$0xff]  ;;  %1073 = vst.msk [vmem:[#allocation2 + $0x138] sm:$0xff] %vm19_vm3, %v1008_v38  ;;  %v1489_v30 = vsel %vm19_vm3, %v2680_v1, 0.0  ;;  %v1683_v1 = vsel %vm19_vm3, %v1619_v14, 0.0  ;;  %v1495_v14 = vsel %vm19_vm3, %v2714_v34, 0.0 }
 0x11b   :  { %1458 = vst.msk [vmem:[%s3406_s2 + $0x90] sm:$0xf] %vm1421_vm4, %v2043_v35  ;;  %v2044_v47 = vpack.c.bf16 %v1138_v43, %v1138_v43  ;;  %v128_v35 = vld [vmem:[#allocation2 + $0x160] sm:$0xff]  ;;  %v97_v43 = vld [vmem:[#allocation2 + $0x68] sm:$0xff] }
 0x11c   :  { %1427 = vst.msk [vmem:[%s3406_s2 + $0x14] sm:$0xf] %vm1421_vm4, %v2012_v36  ;;  %v746_v40 = vpop.f32.mrb[16].mxu0  ;;  %v874_v44 = vpop.f32.mrb[16].mxu1  ;;  %v1686_v36 = vsel %vm19_vm3, %v1621_v19, 0.0 }
 0x11d   :  { %v977_v45 = vadd.f32 %v746_v40, %v92_v37  ;;  %v748_v46 = vpop.f32.mrb[17].mxu0  ;;  %v876_v48 = vpop.f32.mrb[17].mxu1  ;;  %v1009_v53 = vadd.f32 %v874_v44, %v124_v39  ;;  %1459 = vst.msk [vmem:[%s3406_s2 + $0x94] sm:$0xf] %vm1421_vm4, %v2044_v47  ;;  %v1622_v37 = vmul.f32 %v2686_v9, %v2686_v9  ;;  %v1685_v39 = vadd.f32 %v1684_v29, %v1683_v1 }
 0x11e   :  { %v2732_v49 = vld [vmem:[#allocation2 + $0x30] sm:$0xff]  ;;  %v749_v51 = vpop.f32.mrb[18].mxu0  ;;  %v877_v54 = vpop.f32.mrb[18].mxu1  ;;  %v1490_v40 = vadd.f32 %v1489_v30, %v1488_v32  ;;  %v1491_v46 = vsel %vm19_vm3, %v2686_v9, 0.0  ;;  %v1623_v47 = vmul.f32 %v2708_v25, %v2708_v25 }
 0x11f   :  { %v1139_v52 = vld [vmem:[#allocation2 + $0x130] sm:$0xff]  ;;  %v2013_v55 = vpack.c.bf16 %v2732_v49, %v2732_v49  ;;  %1042 = vst.msk [vmem:[#allocation2 + $0x40] sm:$0xff] %vm19_vm3, %v977_v45  ;;  %v978_v56 = vadd.f32 %v749_v51, %v93_v41  ;;  %v751_v57 = vpop.f32.mrb[19].mxu0  ;;  %v879_v59 = vpop.f32.mrb[19].mxu1  ;;  %1074 = vst.msk [vmem:[#allocation2 + $0x140] sm:$0xff] %vm19_vm3, %v1009_v53  ;;  %v1010_v0 = vadd.f32 %v877_v54, %v125_v58  ;;  %v1688_v9 = vsel %vm19_vm3, %v1622_v37, 0.0 }
 0x120   :  { %v2045_v61 = vpack.c.bf16 %v1139_v52, %v1139_v52  ;;  %v1687_v54 = vadd.f32 %v1686_v36, %v1685_v39  ;;  %v1493_v59 = vsel %vm19_vm3, %v2708_v25, 0.0  ;;  %v1624_v25 = vmul.f32 %v2714_v34, %v2714_v34  ;;  %v131_v37 = vld [vmem:[#allocation2 + $0x178] sm:$0xff] }
 0x121   :  { %v2741_v60 = vld [vmem:[#allocation2 + $0x38] sm:$0xff]  ;;  %1428 = vst.msk [vmem:[%s3406_s2 + $0x18] sm:$0xf] %vm1421_vm4, %v2013_v55 }
 0x122   :  { %v2014_v62 = vpack.c.bf16 %v2741_v60, %v2741_v60  ;;  %1043 = vst.msk [vmem:[#allocation2 + $0x48] sm:$0xff] %vm19_vm3, %v978_v56  ;;  %v1140_v3 = vld [vmem:[#allocation2 + $0x138] sm:$0xff]  ;;  %1075 = vst.msk [vmem:[#allocation2 + $0x148] sm:$0xff] %vm19_vm3, %v1010_v0  ;;  %v129_v0 = vld [vmem:[#allocation2 + $0x168] sm:$0xff]  ;;  %v1689_v8 = vadd.f32 %v1688_v9, %v1687_v54  ;;  %v1692_v34 = vsel %vm19_vm3, %v1624_v25, 0.0 }
 0x123   :  { %1460 = vst.msk [vmem:[%s3406_s2 + $0x98] sm:$0xf] %vm1421_vm4, %v2045_v61  ;;  %v2046_v6 = vpack.c.bf16 %v1140_v3, %v1140_v3  ;;  %v1492_v3 = vadd.f32 %v1491_v46, %v1490_v40  ;;  %v101_v9 = vld [vmem:[#allocation2 + $0x88] sm:$0xff] }
 0x124   :  { %1429 = vst.msk [vmem:[%s3406_s2 + $0x1c] sm:$0xf] %vm1421_vm4, %v2014_v62  ;;  %v754_v4 = vpop.f32.mrb[20].mxu0  ;;  %v882_v7 = vpop.f32.mrb[20].mxu1 }
 0x125   :  { %v979_v10 = vadd.f32 %v754_v4, %v94_v63  ;;  %v756_v11 = vpop.f32.mrb[21].mxu0  ;;  %v1011_v12 = vadd.f32 %v882_v7, %v126_v2  ;;  %v884_v13 = vpop.f32.mrb[21].mxu1  ;;  %1461 = vst.msk [vmem:[%s3406_s2 + $0x9c] sm:$0xf] %vm1421_vm4, %v2046_v6  ;;  %v1690_v6 = vsel %vm19_vm3, %v1623_v47, 0.0 }
 0x126   :  { %v2764_v15 = vld [vmem:[#allocation2 + $0x40] sm:$0xff]  ;;  %v757_v16 = vpop.f32.mrb[22].mxu0  ;;  %v885_v17 = vpop.f32.mrb[22].mxu1  ;;  %v98_v11 = vld [vmem:[#allocation2 + $0x70] sm:$0xff]  ;;  %v1691_v18 = vadd.f32 %v1690_v6, %v1689_v8 }
 0x127   :  { %v2015_v20 = vpack.c.bf16 %v2764_v15, %v2764_v15  ;;  %1044 = vst.msk [vmem:[#allocation2 + $0x50] sm:$0xff] %vm19_vm3, %v979_v10  ;;  %v980_v21 = vadd.f32 %v757_v16, %v95_v5  ;;  %v759_v22 = vpop.f32.mrb[23].mxu0  ;;  %v1141_v23 = vld [vmem:[#allocation2 + $0x140] sm:$0xff]  ;;  %1076 = vst.msk [vmem:[#allocation2 + $0x150] sm:$0xff] %vm19_vm3, %v1011_v12  ;;  %v887_v26 = vpop.f32.mrb[23].mxu1  ;;  %v1012_v42 = vadd.f32 %v885_v17, %v127_v24  ;;  %v130_v13 = vld [vmem:[#allocation2 + $0x170] sm:$0xff] }
 0x128   :  { %v2047_v28 = vpack.c.bf16 %v1141_v23, %v1141_v23  ;;  %v1494_v10 = vadd.f32 %v1493_v59, %v1492_v3  ;;  %v1625_v16 = vmul.f32 %v2732_v49, %v2732_v49  ;;  %v1497_v23 = vsel %vm19_vm3, %v2732_v49, 0.0 }
 0x129   :  { %v2778_v27 = vld [vmem:[#allocation2 + $0x48] sm:$0xff]  ;;  %1430 = vst.msk [vmem:[%s3406_s2 + $0x20] sm:$0xf] %vm1421_vm4, %v2015_v20  ;;  %v99_v20 = vld [vmem:[#allocation2 + $0x78] sm:$0xff]  ;;  %v1626_v49 = vmul.f32 %v2741_v60, %v2741_v60  ;;  %v1693_v39 = vadd.f32 %v1692_v34, %v1691_v18 }
 0x12a   :  { %v2016_v31 = vpack.c.bf16 %v2778_v27, %v2778_v27  ;;  %1045 = vst.msk [vmem:[#allocation2 + $0x58] sm:$0xff] %vm19_vm3, %v980_v21  ;;  %v1142_v38 = vld [vmem:[#allocation2 + $0x148] sm:$0xff]  ;;  %1077 = vst.msk [vmem:[#allocation2 + $0x158] sm:$0xff] %vm19_vm3, %v1012_v42  ;;  %v1496_v29 = vadd.f32 %v1495_v14, %v1494_v10  ;;  %v1694_v42 = vsel %vm19_vm3, %v1625_v16, 0.0 }
 0x12b   :  { %1462 = vst.msk [vmem:[%s3406_s2 + $0xa0] sm:$0xf] %vm1421_vm4, %v2047_v28  ;;  %v2048_v44 = vpack.c.bf16 %v1142_v38, %v1142_v38  ;;  %v1695_v47 = vadd.f32 %v1694_v42, %v1693_v39  ;;  %v133_v18 = vld [vmem:[#allocation2 + $0x188] sm:$0xff] }
 0x12c   :  { %1431 = vst.msk [vmem:[%s3406_s2 + $0x24] sm:$0xf] %vm1421_vm4, %v2016_v31  ;;  %v762_v41 = vpop.f32.mrb[24].mxu0  ;;  %v890_v45 = vpop.f32.mrb[24].mxu1  ;;  %v1498_v40 = vadd.f32 %v1497_v23, %v1496_v29 }
 0x12d   :  { %v981_v48 = vadd.f32 %v762_v41, %v96_v33  ;;  %v764_v51 = vpop.f32.mrb[25].mxu0  ;;  %v1013_v52 = vadd.f32 %v890_v45, %v128_v35  ;;  %v892_v53 = vpop.f32.mrb[25].mxu1  ;;  %1463 = vst.msk [vmem:[%s3406_s2 + $0xa4] sm:$0xf] %vm1421_vm4, %v2048_v44  ;;  %v1499_v44 = vsel %vm19_vm3, %v2741_v60, 0.0  ;;  %v1627_v45 = vmul.f32 %v2764_v15, %v2764_v15 }
 0x12e   :  { %v2809_v55 = vld [vmem:[#allocation2 + $0x50] sm:$0xff]  ;;  %v765_v56 = vpop.f32.mrb[26].mxu0  ;;  %v893_v58 = vpop.f32.mrb[26].mxu1  ;;  %v132_v51 = vld [vmem:[#allocation2 + $0x180] sm:$0xff]  ;;  %v1501_v53 = vsel %vm19_vm3, %v2764_v15, 0.0  ;;  %v1628_v15 = vmul.f32 %v2778_v27, %v2778_v27 }
 0x12f   :  { %v2815_v57 = vld [vmem:[#allocation2 + $0x150] sm:$0xff]  ;;  %v2017_v61 = vpack.c.bf16 %v2809_v55, %v2809_v55  ;;  %1046 = vst.msk [vmem:[#allocation2 + $0x60] sm:$0xff] %vm19_vm3, %v981_v48  ;;  %v982_v62 = vadd.f32 %v765_v56, %v97_v43  ;;  %v767_v63 = vpop.f32.mrb[27].mxu0  ;;  %1078 = vst.msk [vmem:[#allocation2 + $0x160] sm:$0xff] %vm19_vm3, %v1013_v52  ;;  %v895_v2 = vpop.f32.mrb[27].mxu1  ;;  %v1014_v12 = vadd.f32 %v893_v58, %v129_v0  ;;  %v100_v48 = vld [vmem:[#allocation2 + $0x80] sm:$0xff] }
 0x130   :  { %v2049_v5 = vpack.c.bf16 %v2815_v57, %v2815_v57  ;;  %v1696_v52 = vsel %vm19_vm3, %v1626_v49, 0.0  ;;  %v1500_v56 = vadd.f32 %v1499_v44, %v1498_v40  ;;  %v1505_v34 = vsel %vm19_vm3, %v2809_v55, 0.0 }
 0x131   :  { %v2824_v4 = vld [vmem:[#allocation2 + $0x58] sm:$0xff]  ;;  %1432 = vst.msk [vmem:[%s3406_s2 + $0x28] sm:$0xf] %vm1421_vm4, %v2017_v61 }
 0x132   :  { %v2018_v7 = vpack.c.bf16 %v2824_v4, %v2824_v4  ;;  %1047 = vst.msk [vmem:[#allocation2 + $0x68] sm:$0xff] %vm19_vm3, %v982_v62  ;;  %v2850_v17 = vld [vmem:[#allocation2 + $0x158] sm:$0xff]  ;;  %1079 = vst.msk [vmem:[#allocation2 + $0x168] sm:$0xff] %vm19_vm3, %v1014_v12  ;;  %v1698_v62 = vsel %vm19_vm3, %v1627_v45, 0.0  ;;  %v1502_v6 = vadd.f32 %v1501_v53, %v1500_v56  ;;  %v1629_v12 = vmul.f32 %v2809_v55, %v2809_v55 }
 0x133   :  { %1464 = vst.msk [vmem:[%s3406_s2 + $0xa8] sm:$0xf] %vm1421_vm4, %v2049_v5  ;;  %v2050_v21 = vpack.c.bf16 %v2850_v17, %v2850_v17  ;;  %v1697_v5 = vadd.f32 %v1696_v52, %v1695_v47  ;;  %v1630_v29 = vmul.f32 %v2824_v4, %v2824_v4 }
 0x134   :  { %1433 = vst.msk [vmem:[%s3406_s2 + $0x2c] sm:$0xf] %vm1421_vm4, %v2018_v7  ;;  %v770_v19 = vpop.f32.mrb[28].mxu0  ;;  %v898_v22 = vpop.f32.mrb[28].mxu1  ;;  %v1702_v55 = vsel %vm19_vm3, %v1629_v12, 0.0 }
 0x135   :  { %v983_v24 = vadd.f32 %v770_v19, %v98_v11  ;;  %v772_v26 = vpop.f32.mrb[29].mxu0  ;;  %v1015_v28 = vadd.f32 %v898_v22, %v130_v13  ;;  %v900_v50 = vpop.f32.mrb[29].mxu1  ;;  %1465 = vst.msk [vmem:[%s3406_s2 + $0xac] sm:$0xf] %vm1421_vm4, %v2050_v21  ;;  %v1503_v11 = vsel %vm19_vm3, %v2778_v27, 0.0  ;;  %v1700_v22 = vsel %vm19_vm3, %v1628_v15, 0.0 }
 0x136   :  { %v2858_v30 = vld [vmem:[#allocation2 + $0x60] sm:$0xff]  ;;  %v773_v31 = vpop.f32.mrb[30].mxu0  ;;  %v901_v33 = vpop.f32.mrb[30].mxu1  ;;  %v102_v26 = vld [vmem:[#allocation2 + $0x90] sm:$0xff] }
 0x137   :  { %v2864_v32 = vld [vmem:[#allocation2 + $0x160] sm:$0xff]  ;;  %v2019_v35 = vpack.c.bf16 %v2858_v30, %v2858_v30  ;;  %1048 = vst.msk [vmem:[#allocation2 + $0x70] sm:$0xff] %vm19_vm3, %v983_v24  ;;  %v984_v1 = vadd.f32 %v773_v31, %v99_v20  ;;  %v775_v36 = vpop.f32.mrb[31].mxu0  ;;  %1080 = vst.msk [vmem:[#allocation2 + $0x170] sm:$0xff] %vm19_vm3, %v1015_v28  ;;  %v903_v38 = vpop.f32.mrb[31].mxu1  ;;  %v1016_v60 = vadd.f32 %v901_v33, %v131_v37  ;;  %v134_v50 = vld [vmem:[#allocation2 + $0x190] sm:$0xff] }
 0x138   :  { %v2051_v43 = vpack.c.bf16 %v2864_v32, %v2864_v32  ;;  %v1699_v20 = vadd.f32 %v1698_v62, %v1697_v5  ;;  %v1504_v24 = vadd.f32 %v1503_v11, %v1502_v6  ;;  %v1507_v37 = vsel %vm19_vm3, %v2824_v4, 0.0  ;;  %v136_v6 = vld [vmem:[#allocation2 + $0x1a0] sm:$0xff] }
 0x139   :  { %v2873_v41 = vld [vmem:[#allocation2 + $0x68] sm:$0xff]  ;;  %1434 = vst.msk [vmem:[%s3406_s2 + $0x30] sm:$0xf] %vm1421_vm4, %v2019_v35  ;;  %v103_v35 = vld [vmem:[#allocation2 + $0x98] sm:$0xff]  ;;  %v1631_v38 = vmul.f32 %v2858_v30, %v2858_v30  ;;  %v1704_v4 = vsel %vm19_vm3, %v1630_v29, 0.0 }
 0x13a   :  { %v2020_v46 = vpack.c.bf16 %v2873_v41, %v2873_v41  ;;  %1049 = vst.msk [vmem:[#allocation2 + $0x78] sm:$0xff] %vm19_vm3, %v984_v1  ;;  %v2899_v54 = vld [vmem:[#allocation2 + $0x168] sm:$0xff]  ;;  %1081 = vst.msk [vmem:[#allocation2 + $0x178] sm:$0xff] %vm19_vm3, %v1016_v60  ;;  %v1701_v33 = vadd.f32 %v1700_v22, %v1699_v20  ;;  %v1506_v42 = vadd.f32 %v1505_v34, %v1504_v24 }
 0x13b   :  { %1466 = vst.msk [vmem:[%s3406_s2 + $0xb0] sm:$0xf] %vm1421_vm4, %v2051_v43  ;;  %v2052_v59 = vpack.c.bf16 %v2899_v54, %v2899_v54  ;;  %v1706_v15 = vsel %vm19_vm3, %v1631_v38, 0.0 }
 0x13c   :  { %1435 = vst.msk [vmem:[%s3406_s2 + $0x34] sm:$0xf] %vm1421_vm4, %v2020_v46  ;;  %v778_v58 = vpop.f32.mrb[32].mxu0  ;;  %v906_v61 = vpop.f32.mrb[32].mxu1  ;;  %v1703_v45 = vadd.f32 %v1702_v55, %v1701_v33 }
 0x13d   :  { %v985_v63 = vadd.f32 %v778_v58, %v100_v48  ;;  %v780_v0 = vpop.f32.mrb[33].mxu0  ;;  %v1017_v2 = vadd.f32 %v906_v61, %v132_v51  ;;  %v908_v3 = vpop.f32.mrb[33].mxu1  ;;  %1467 = vst.msk [vmem:[%s3406_s2 + $0xb4] sm:$0xf] %vm1421_vm4, %v2052_v59  ;;  %v1509_v51 = vsel %vm19_vm3, %v2858_v30, 0.0  ;;  %v135_v58 = vld [vmem:[#allocation2 + $0x198] sm:$0xff]  ;;  %v1508_v59 = vadd.f32 %v1507_v37, %v1506_v42 }
 0x13e   :  { %v2907_v25 = vld [vmem:[#allocation2 + $0x70] sm:$0xff]  ;;  %v781_v7 = vpop.f32.mrb[34].mxu0  ;;  %v909_v10 = vpop.f32.mrb[34].mxu1  ;;  %v1632_v30 = vmul.f32 %v2873_v41, %v2873_v41  ;;  %v1705_v0 = vadd.f32 %v1704_v4, %v1703_v45  ;;  %v104_v3 = vld [vmem:[#allocation2 + $0xa0] sm:$0xff] }
 0x13f   :  { %v2913_v8 = vld [vmem:[#allocation2 + $0x170] sm:$0xff]  ;;  %v2021_v13 = vpack.c.bf16 %v2907_v25, %v2907_v25  ;;  %1050 = vst.msk [vmem:[#allocation2 + $0x80] sm:$0xff] %vm19_vm3, %v985_v63  ;;  %v986_v14 = vadd.f32 %v781_v7, %v101_v9  ;;  %v783_v16 = vpop.f32.mrb[35].mxu0  ;;  %1082 = vst.msk [vmem:[#allocation2 + $0x180] sm:$0xff] %vm19_vm3, %v1017_v2  ;;  %v911_v19 = vpop.f32.mrb[35].mxu1  ;;  %v1018_v28 = vadd.f32 %v909_v10, %v133_v18  ;;  %v1511_v7 = vsel %vm19_vm3, %v2873_v41, 0.0 }
 0x140   :  { %v2053_v27 = vpack.c.bf16 %v2913_v8, %v2913_v8  ;;  %v1510_v2 = vadd.f32 %v1509_v51, %v1508_v59  ;;  %v1633_v10 = vmul.f32 %v2907_v25, %v2907_v25  ;;  %v1707_v12 = vadd.f32 %v1706_v15, %v1705_v0  ;;  %v106_v45 = vld [vmem:[#allocation2 + $0xb0] sm:$0xff]  ;;  %v139_v0 = vld [vmem:[#allocation2 + $0x1b8] sm:$0xff] }
 0x141   :  { %v2923_v21 = vld [vmem:[#allocation2 + $0x78] sm:$0xff]  ;;  %1436 = vst.msk [vmem:[%s3406_s2 + $0x38] sm:$0xf] %vm1421_vm4, %v2021_v13  ;;  %v1708_v41 = vsel %vm19_vm3, %v1632_v30, 0.0  ;;  %v1513_v19 = vsel %vm19_vm3, %v2907_v25, 0.0 }
 0x142   :  { %v2022_v23 = vpack.c.bf16 %v2923_v21, %v2923_v21  ;;  %1051 = vst.msk [vmem:[#allocation2 + $0x88] sm:$0xff] %vm19_vm3, %v986_v14  ;;  %v2948_v31 = vld [vmem:[#allocation2 + $0x178] sm:$0xff]  ;;  %1083 = vst.msk [vmem:[#allocation2 + $0x188] sm:$0xff] %vm19_vm3, %v1018_v28  ;;  %v105_v14 = vld [vmem:[#allocation2 + $0xa8] sm:$0xff]  ;;  %v1710_v55 = vsel %vm19_vm3, %v1633_v10, 0.0  ;;  %v1634_v25 = vmul.f32 %v2923_v21, %v2923_v21 }
 0x143   :  { %1468 = vst.msk [vmem:[%s3406_s2 + $0xb8] sm:$0xf] %vm1421_vm4, %v2053_v27  ;;  %v2054_v1 = vpack.c.bf16 %v2948_v31, %v2948_v31 }
 0x144   :  { %1437 = vst.msk [vmem:[%s3406_s2 + $0x3c] sm:$0xf] %vm1421_vm4, %v2022_v23  ;;  %v786_v49 = vpop.f32.mrb[36].mxu0  ;;  %v914_v36 = vpop.f32.mrb[36].mxu1  ;;  %v1512_v23 = vadd.f32 %v1511_v7, %v1510_v2 }
 0x145   :  { %v987_v39 = vadd.f32 %v786_v49, %v102_v26  ;;  %v788_v40 = vpop.f32.mrb[37].mxu0  ;;  %v1019_v43 = vadd.f32 %v914_v36, %v134_v50  ;;  %v916_v44 = vpop.f32.mrb[37].mxu1  ;;  %1469 = vst.msk [vmem:[%s3406_s2 + $0xbc] sm:$0xf] %vm1421_vm4, %v2054_v1  ;;  %v137_v49 = vld [vmem:[#allocation2 + $0x1a8] sm:$0xff]  ;;  %v1709_v1 = vadd.f32 %v1708_v41, %v1707_v12 }
 0x146   :  { %v2957_v46 = vld [vmem:[#allocation2 + $0x80] sm:$0xff]  ;;  %v789_v47 = vpop.f32.mrb[38].mxu0  ;;  %v917_v60 = vpop.f32.mrb[38].mxu1  ;;  %v1514_v36 = vadd.f32 %v1513_v19, %v1512_v23 }
 0x147   :  { %v2963_v48 = vld [vmem:[#allocation2 + $0x180] sm:$0xff]  ;;  %v2023_v52 = vpack.c.bf16 %v2957_v46, %v2957_v46  ;;  %1052 = vst.msk [vmem:[#allocation2 + $0x90] sm:$0xff] %vm19_vm3, %v987_v39  ;;  %v988_v53 = vadd.f32 %v789_v47, %v103_v35  ;;  %v791_v56 = vpop.f32.mrb[39].mxu0  ;;  %1084 = vst.msk [vmem:[#allocation2 + $0x190] sm:$0xff] %vm19_vm3, %v1019_v43  ;;  %v919_v9 = vpop.f32.mrb[39].mxu1  ;;  %v1020_v5 = vadd.f32 %v917_v60, %v135_v58  ;;  %v1515_v39 = vsel %vm19_vm3, %v2923_v21, 0.0 }
 0x148   :  { %v2055_v62 = vpack.c.bf16 %v2963_v48, %v2963_v48  ;;  %v1635_v40 = vmul.f32 %v2957_v46, %v2957_v46  ;;  %v1711_v44 = vadd.f32 %v1710_v55, %v1709_v1  ;;  %v138_v47 = vld [vmem:[#allocation2 + $0x1b0] sm:$0xff]  ;;  %v1712_v60 = vsel %vm19_vm3, %v1634_v25, 0.0  ;;  %v107_v56 = vld [vmem:[#allocation2 + $0xb8] sm:$0xff]  ;;  %v140_v55 = vld [vmem:[#allocation2 + $0x1c0] sm:$0xff] }
 0x149   :  { %v2972_v61 = vld [vmem:[#allocation2 + $0x88] sm:$0xff]  ;;  %1438 = vst.msk [vmem:[%s3406_s2 + $0x40] sm:$0xf] %vm1421_vm4, %v2023_v52  ;;  %v1517_v4 = vsel %vm19_vm3, %v2957_v46, 0.0  ;;  %v1516_v52 = vadd.f32 %v1515_v39, %v1514_v36 }
 0x14a   :  { %v2024_v63 = vpack.c.bf16 %v2972_v61, %v2972_v61  ;;  %1053 = vst.msk [vmem:[#allocation2 + $0x98] sm:$0xff] %vm19_vm3, %v988_v53  ;;  %v2998_v11 = vld [vmem:[#allocation2 + $0x188] sm:$0xff]  ;;  %1085 = vst.msk [vmem:[#allocation2 + $0x198] sm:$0xff] %vm19_vm3, %v1020_v5  ;;  %v1714_v59 = vsel %vm19_vm3, %v1635_v40, 0.0  ;;  %v1636_v46 = vmul.f32 %v2972_v61, %v2972_v61  ;;  %v1713_v2 = vadd.f32 %v1712_v60, %v1711_v44 }
 0x14b   :  { %1470 = vst.msk [vmem:[%s3406_s2 + $0xc0] sm:$0xf] %vm1421_vm4, %v2055_v62  ;;  %v2056_v16 = vpack.c.bf16 %v2998_v11, %v2998_v11  ;;  %v1519_v12 = vsel %vm19_vm3, %v2972_v61, 0.0 }
 0x14c   :  { %1439 = vst.msk [vmem:[%s3406_s2 + $0x44] sm:$0xf] %vm1421_vm4, %v2024_v63  ;;  %v794_v13 = vpop.f32.mrb[40].mxu0  ;;  %v922_v18 = vpop.f32.mrb[40].mxu1  ;;  %v1715_v19 = vadd.f32 %v1714_v59, %v1713_v2 }
 0x14d   :  { %v989_v20 = vadd.f32 %v794_v13, %v104_v3  ;;  %v796_v27 = vpop.f32.mrb[41].mxu0  ;;  %v1021_v22 = vadd.f32 %v922_v18, %v136_v6  ;;  %v924_v34 = vpop.f32.mrb[41].mxu1  ;;  %1471 = vst.msk [vmem:[%s3406_s2 + $0xc4] sm:$0xf] %vm1421_vm4, %v2056_v16  ;;  %v1518_v3 = vadd.f32 %v1517_v4, %v1516_v52 }
 0x14e   :  { %v3006_v24 = vld [vmem:[#allocation2 + $0x90] sm:$0xff]  ;;  %v797_v26 = vpop.f32.mrb[42].mxu0  ;;  %v925_v50 = vpop.f32.mrb[42].mxu1  ;;  %v1716_v34 = vsel %vm19_vm3, %v1636_v46, 0.0 }
 0x14f   :  { %v3012_v28 = vld [vmem:[#allocation2 + $0x190] sm:$0xff]  ;;  %v2025_v29 = vpack.c.bf16 %v3006_v24, %v3006_v24  ;;  %1054 = vst.msk [vmem:[#allocation2 + $0xa0] sm:$0xff] %vm19_vm3, %v989_v20  ;;  %v990_v33 = vadd.f32 %v797_v26, %v105_v14  ;;  %v799_v42 = vpop.f32.mrb[43].mxu0  ;;  %1086 = vst.msk [vmem:[#allocation2 + $0x1a0] sm:$0xff] %vm19_vm3, %v1021_v22  ;;  %v927_v35 = vpop.f32.mrb[43].mxu1  ;;  %v1022_v21 = vadd.f32 %v925_v50, %v137_v49  ;;  %v1521_v61 = vsel %vm19_vm3, %v3006_v24, 0.0 }
 0x150   :  { %v2057_v38 = vpack.c.bf16 %v3012_v28, %v3012_v28  ;;  %v1637_v13 = vmul.f32 %v3006_v24, %v3006_v24  ;;  %v1520_v26 = vadd.f32 %v1519_v12, %v1518_v3  ;;  %v108_v50 = vld [vmem:[#allocation2 + $0xc0] sm:$0xff]  ;;  %v109_v35 = vld [vmem:[#allocation2 + $0xc8] sm:$0xff]  ;;  %v110_v12 = vld [vmem:[#allocation2 + $0xd0] sm:$0xff] }
 0x151   :  { %v3021_v37 = vld [vmem:[#allocation2 + $0x98] sm:$0xff]  ;;  %1440 = vst.msk [vmem:[%s3406_s2 + $0x48] sm:$0xf] %vm1421_vm4, %v2025_v29 }
 0x152   :  { %v2026_v43 = vpack.c.bf16 %v3021_v37, %v3021_v37  ;;  %1055 = vst.msk [vmem:[#allocation2 + $0xa8] sm:$0xff] %vm19_vm3, %v990_v33  ;;  %v3047_v51 = vld [vmem:[#allocation2 + $0x198] sm:$0xff]  ;;  %1087 = vst.msk [vmem:[#allocation2 + $0x1a8] sm:$0xff] %vm19_vm3, %v1022_v21  ;;  %v1718_v24 = vsel %vm19_vm3, %v1637_v13, 0.0  ;;  %v1638_v25 = vmul.f32 %v3021_v37, %v3021_v37  ;;  %v1717_v33 = vadd.f32 %v1716_v34, %v1715_v19  ;;  %v141_v21 = vld [vmem:[#allocation2 + $0x1c8] sm:$0xff] }
 0x153   :  { %1472 = vst.msk [vmem:[%s3406_s2 + $0xc8] sm:$0xf] %vm1421_vm4, %v2057_v38  ;;  %v2058_v58 = vpack.c.bf16 %v3047_v51, %v3047_v51  ;;  %v1522_v42 = vadd.f32 %v1521_v61, %v1520_v26  ;;  %v1523_v38 = vsel %vm19_vm3, %v3021_v37, 0.0  ;;  %v142_v13 = vld [vmem:[#allocation2 + $0x1d0] sm:$0xff] }
 0x154   :  { %1441 = vst.msk [vmem:[%s3406_s2 + $0x4c] sm:$0xf] %vm1421_vm4, %v2026_v43  ;;  %v802_v53 = vpop.f32.mrb[44].mxu0  ;;  %v930_v9 = vpop.f32.mrb[44].mxu1 }
 0x155   :  { %v991_v62 = vadd.f32 %v802_v53, %v106_v45  ;;  %v804_v15 = vpop.f32.mrb[45].mxu0  ;;  %v1023_v30 = vadd.f32 %v930_v9, %v138_v47  ;;  %v932_v63 = vpop.f32.mrb[45].mxu1  ;;  %1473 = vst.msk [vmem:[%s3406_s2 + $0xcc] sm:$0xf] %vm1421_vm4, %v2058_v58  ;;  %v1719_v47 = vadd.f32 %v1718_v24, %v1717_v33 }
 0x156   :  { %v1121_v5 = vld [vmem:[#allocation2 + $0xa0] sm:$0xff]  ;;  %v805_v6 = vpop.f32.mrb[46].mxu0  ;;  %v933_v10 = vpop.f32.mrb[46].mxu1 }
 0x157   :  { %v3059_v7 = vld [vmem:[#allocation2 + $0x1a0] sm:$0xff]  ;;  %v2027_v14 = vpack.c.bf16 %v1121_v5, %v1121_v5  ;;  %1056 = vst.msk [vmem:[#allocation2 + $0xb0] sm:$0xff] %vm19_vm3, %v991_v62  ;;  %v992_v16 = vadd.f32 %v805_v6, %v107_v56  ;;  %v807_v18 = vpop.f32.mrb[47].mxu0  ;;  %1088 = vst.msk [vmem:[#allocation2 + $0x1b0] sm:$0xff] %vm19_vm3, %v1023_v30  ;;  %v935_v41 = vpop.f32.mrb[47].mxu1  ;;  %v1024_v22 = vadd.f32 %v933_v10, %v139_v0  ;;  %v1720_v56 = vsel %vm19_vm3, %v1638_v25, 0.0 }
 0x158   :  { %v2059_v27 = vpack.c.bf16 %v3059_v7, %v3059_v7  ;;  %v1639_v39 = vmul.f32 %v1121_v5, %v1121_v5  ;;  %v1525_v37 = vsel %vm19_vm3, %v1121_v5, 0.0  ;;  %v1524_v62 = vadd.f32 %v1523_v38, %v1522_v42 }
 0x159   :  { %v1122_v20 = vld [vmem:[#allocation2 + $0xa8] sm:$0xff]  ;;  %1442 = vst.msk [vmem:[%s3406_s2 + $0x50] sm:$0xf] %vm1421_vm4, %v2027_v14  ;;  %v1721_v6 = vadd.f32 %v1720_v56, %v1719_v47 }
 0x15a   :  { %v2028_v23 = vpack.c.bf16 %v1122_v20, %v1122_v20  ;;  %1057 = vst.msk [vmem:[#allocation2 + $0xb8] sm:$0xff] %vm19_vm3, %v992_v16  ;;  %1089 = vst.msk [vmem:[#allocation2 + $0x1b8] sm:$0xff] %vm19_vm3, %v1024_v22  ;;  %v3089_v29 = vld [vmem:[#allocation2 + $0x1a8] sm:$0xff]  ;;  %v1722_v0 = vsel %vm19_vm3, %v1639_v39, 0.0  ;;  %v1640_v2 = vmul.f32 %v1122_v20, %v1122_v20  ;;  %v1526_v10 = vadd.f32 %v1525_v37, %v1524_v62 }
 0x15b   :  { %1474 = vst.msk [vmem:[%s3406_s2 + $0xd0] sm:$0xf] %vm1421_vm4, %v2059_v27  ;;  %v2060_v36 = vpack.c.bf16 %v3089_v29, %v3089_v29  ;;  %v1527_v16 = vsel %vm19_vm3, %v1122_v20, 0.0  ;;  %v1723_v41 = vadd.f32 %v1722_v0, %v1721_v6  ;;  %v111_v27 = vld [vmem:[#allocation2 + $0xd8] sm:$0xff] }
 0x15c   :  { %1443 = vst.msk [vmem:[%s3406_s2 + $0x54] sm:$0xf] %vm1421_vm4, %v2028_v23  ;;  %v810_v49 = vpop.f32.mrb[48].mxu0  ;;  %v938_v1 = vpop.f32.mrb[48].mxu1  ;;  %v1724_v34 = vsel %vm19_vm3, %v1640_v2, 0.0  ;;  %v1528_v24 = vadd.f32 %v1527_v16, %v1526_v10 }
 0x15d   :  { %v993_v40 = vadd.f32 %v810_v49, %v108_v50  ;;  %v812_v43 = vpop.f32.mrb[49].mxu0  ;;  %v1025_v44 = vadd.f32 %v938_v1, %v140_v55  ;;  %v940_v45 = vpop.f32.mrb[49].mxu1  ;;  %1475 = vst.msk [vmem:[%s3406_s2 + $0xd4] sm:$0xf] %vm1421_vm4, %v2060_v36  ;;  %v143_v55 = vld [vmem:[#allocation2 + $0x1d8] sm:$0xff] }
 0x15e   :  { %v1123_v60 = vld [vmem:[#allocation2 + $0xb0] sm:$0xff]  ;;  %v813_v4 = vpop.f32.mrb[50].mxu0  ;;  %v941_v52 = vpop.f32.mrb[50].mxu1  ;;  %v1725_v43 = vadd.f32 %v1724_v34, %v1723_v41 }
 0x15f   :  { %v3095_v53 = vld [vmem:[#allocation2 + $0x1b0] sm:$0xff]  ;;  %v2029_v58 = vpack.c.bf16 %v1123_v60, %v1123_v60  ;;  %1058 = vst.msk [vmem:[#allocation2 + $0xc0] sm:$0xff] %vm19_vm3, %v993_v40  ;;  %v994_v9 = vadd.f32 %v813_v4, %v109_v35  ;;  %v815_v59 = vpop.f32.mrb[51].mxu0  ;;  %1090 = vst.msk [vmem:[#allocation2 + $0x1c0] sm:$0xff] %vm19_vm3, %v1025_v44  ;;  %v943_v46 = vpop.f32.mrb[51].mxu1  ;;  %v1026_v30 = vadd.f32 %v941_v52, %v141_v21  ;;  %v1529_v61 = vsel %vm19_vm3, %v1123_v60, 0.0 }
 0x160   :  { %v2061_v63 = vpack.c.bf16 %v3095_v53, %v3095_v53  ;;  %v1641_v18 = vmul.f32 %v1123_v60, %v1123_v60  ;;  %v1530_v44 = vadd.f32 %v1529_v61, %v1528_v24 }
 0x161   :  { %v1124_v15 = vld [vmem:[#allocation2 + $0xb8] sm:$0xff]  ;;  %1444 = vst.msk [vmem:[%s3406_s2 + $0x58] sm:$0xf] %vm1421_vm4, %v2029_v58  ;;  %v112_v58 = vld [vmem:[#allocation2 + $0xe0] sm:$0xff] }
 0x162   :  { %v2030_v3 = vpack.c.bf16 %v1124_v15, %v1124_v15  ;;  %1059 = vst.msk [vmem:[#allocation2 + $0xc8] sm:$0xff] %vm19_vm3, %v994_v9  ;;  %v3113_v5 = vld [vmem:[#allocation2 + $0x1b8] sm:$0xff]  ;;  %1091 = vst.msk [vmem:[#allocation2 + $0x1c8] sm:$0xff] %vm19_vm3, %v1026_v30  ;;  %v1726_v35 = vsel %vm19_vm3, %v1641_v18, 0.0  ;;  %v1642_v1 = vmul.f32 %v1124_v15, %v1124_v15  ;;  %v1531_v60 = vsel %vm19_vm3, %v1124_v15, 0.0  ;;  %v144_v9 = vld [vmem:[#allocation2 + $0x1e0] sm:$0xff] }
 0x163   :  { %v2062_v14 = vpack.c.bf16 %v3113_v5, %v3113_v5  ;;  %1476 = vst.msk [vmem:[%s3406_s2 + $0xd8] sm:$0xf] %vm1421_vm4, %v2061_v63  ;;  %v1727_v37 = vadd.f32 %v1726_v35, %v1725_v43  ;;  %v1532_v15 = vadd.f32 %v1531_v60, %v1530_v44  ;;  %v113_v63 = vld [vmem:[#allocation2 + $0xe8] sm:$0xff]  ;;  %v146_v43 = vld [vmem:[#allocation2 + $0x1f0] sm:$0xff] }
 0x164   :  { %1445 = vst.msk [vmem:[%s3406_s2 + $0x5c] sm:$0xf] %vm1421_vm4, %v2030_v3  ;;  %v818_v19 = vpop.f32.mrb[52].mxu0  ;;  %v946_v22 = vpop.f32.mrb[52].mxu1  ;;  %v1728_v46 = vsel %vm19_vm3, %v1642_v1, 0.0 }
 0x165   :  { %1477 = vst.msk [vmem:[%s3406_s2 + $0xdc] sm:$0xf] %vm1421_vm4, %v2062_v14  ;;  %v995_v20 = vadd.f32 %v818_v19, %v110_v12  ;;  %v820_v23 = vpop.f32.mrb[53].mxu0  ;;  %v1027_v26 = vadd.f32 %v946_v22, %v142_v13  ;;  %v948_v50 = vpop.f32.mrb[53].mxu1  ;;  %v145_v14 = vld [vmem:[#allocation2 + $0x1e8] sm:$0xff]  ;;  %v1729_v16 = vadd.f32 %v1728_v46, %v1727_v37 }
 0x166   :  { %v1125_v25 = vld [vmem:[#allocation2 + $0xc0] sm:$0xff]  ;;  %v821_v33 = vpop.f32.mrb[54].mxu0  ;;  %v949_v42 = vpop.f32.mrb[54].mxu1 }
 0x167   :  { %v3133_v49 = vld [vmem:[#allocation2 + $0x1c0] sm:$0xff]  ;;  %v2031_v36 = vpack.c.bf16 %v1125_v25, %v1125_v25  ;;  %1060 = vst.msk [vmem:[#allocation2 + $0xd0] sm:$0xff] %vm19_vm3, %v995_v20  ;;  %v996_v38 = vadd.f32 %v821_v33, %v111_v27  ;;  %v823_v39 = vpop.f32.mrb[55].mxu0  ;;  %1092 = vst.msk [vmem:[#allocation2 + $0x1d0] sm:$0xff] %vm19_vm3, %v1027_v26  ;;  %v951_v40 = vpop.f32.mrb[55].mxu1  ;;  %v1028_v21 = vadd.f32 %v949_v42, %v143_v55  ;;  %v1533_v62 = vsel %vm19_vm3, %v1125_v25, 0.0 }
 0x168   :  { %v2063_v47 = vpack.c.bf16 %v3133_v49, %v3133_v49  ;;  %v1643_v4 = vmul.f32 %v1125_v25, %v1125_v25  ;;  %v1534_v18 = vadd.f32 %v1533_v62, %v1532_v15  ;;  %v114_v40 = vld [vmem:[#allocation2 + $0xf0] sm:$0xff]  ;;  %v147_v62 = vld [vmem:[#allocation2 + $0x1f8] sm:$0xff] }
 0x169   :  { %v1126_v45 = vld [vmem:[#allocation2 + $0xc8] sm:$0xff]  ;;  %1446 = vst.msk [vmem:[%s3406_s2 + $0x60] sm:$0xf] %vm1421_vm4, %v2031_v36 }
 0x16a   :  { %v2032_v52 = vpack.c.bf16 %v1126_v45, %v1126_v45  ;;  %1061 = vst.msk [vmem:[#allocation2 + $0xd8] sm:$0xff] %vm19_vm3, %v996_v38  ;;  %v3146_v56 = vld [vmem:[#allocation2 + $0x1c8] sm:$0xff]  ;;  %1093 = vst.msk [vmem:[#allocation2 + $0x1d8] sm:$0xff] %vm19_vm3, %v1028_v21  ;;  %v1730_v2 = vsel %vm19_vm3, %v1643_v4, 0.0  ;;  %v1644_v3 = vmul.f32 %v1126_v45, %v1126_v45  ;;  %v1535_v34 = vsel %vm19_vm3, %v1126_v45, 0.0  ;;  %v115_v4 = vld [vmem:[#allocation2 + $0xf8] sm:$0xff] }
 0x16b   :  { %v2064_v59 = vpack.c.bf16 %v3146_v56, %v3146_v56  ;;  %1478 = vst.msk [vmem:[%s3406_s2 + $0xe0] sm:$0xf] %vm1421_vm4, %v2063_v47  ;;  %v1731_v55 = vadd.f32 %v1730_v2, %v1729_v16  ;;  %v1536_v38 = vadd.f32 %v1535_v34, %v1534_v18 }
 0x16c   :  { %1447 = vst.msk [vmem:[%s3406_s2 + $0x64] sm:$0xf] %vm1421_vm4, %v2032_v52  ;;  %v826_v30 = vpop.f32.mrb[56].mxu0  ;;  %v954_v0 = vpop.f32.mrb[56].mxu1  ;;  %v1732_v42 = vsel %vm19_vm3, %v1644_v3, 0.0 }
 0x16d   :  { %1479 = vst.msk [vmem:[%s3406_s2 + $0xe4] sm:$0xf] %vm1421_vm4, %v2064_v59  ;;  %v997_v6 = vadd.f32 %v826_v30, %v112_v58  ;;  %v828_v10 = vpop.f32.mrb[57].mxu0  ;;  %v1029_v12 = vadd.f32 %v954_v0, %v144_v9  ;;  %v956_v13 = vpop.f32.mrb[57].mxu1  ;;  %v1733_v21 = vadd.f32 %v1732_v42, %v1731_v55 }
 0x16e   :  { %v1127_v41 = vld [vmem:[#allocation2 + $0xd0] sm:$0xff]  ;;  %v829_v19 = vpop.f32.mrb[58].mxu0  ;;  %v957_v27 = vpop.f32.mrb[58].mxu1 }
 0x16f   :  { %v3166_v22 = vld [vmem:[#allocation2 + $0x1d0] sm:$0xff]  ;;  %v2033_v61 = vpack.c.bf16 %v1127_v41, %v1127_v41  ;;  %v1645_v20 = vmul.f32 %v1127_v41, %v1127_v41  ;;  %1062 = vst.msk [vmem:[#allocation2 + $0xe0] sm:$0xff] %vm19_vm3, %v997_v6  ;;  %v998_v23 = vadd.f32 %v829_v19, %v113_v63  ;;  %v831_v26 = vpop.f32.mrb[59].mxu0  ;;  %1094 = vst.msk [vmem:[#allocation2 + $0x1e0] sm:$0xff] %vm19_vm3, %v1029_v12  ;;  %v959_v50 = vpop.f32.mrb[59].mxu1  ;;  %v1537_v35 = vsel %vm19_vm3, %v1127_v41, 0.0 }
 0x170   :  { %v1030_v25 = vadd.f32 %v957_v27, %v145_v14  ;;  %v2065_v33 = vpack.c.bf16 %v3166_v22, %v3166_v22  ;;  %v1538_v47 = vadd.f32 %v1537_v35, %v1536_v38 }
 0x171   :  { %v1128_v24 = vld [vmem:[#allocation2 + $0xd8] sm:$0xff]  ;;  %1448 = vst.msk [vmem:[%s3406_s2 + $0x68] sm:$0xf] %vm1421_vm4, %v2033_v61  ;;  %v1734_v45 = vsel %vm19_vm3, %v1645_v20, 0.0 }
 0x172   :  { %v2034_v1 = vpack.c.bf16 %v1128_v24, %v1128_v24  ;;  %1063 = vst.msk [vmem:[#allocation2 + $0xe8] sm:$0xff] %vm19_vm3, %v998_v23  ;;  %v3180_v36 = vld [vmem:[#allocation2 + $0x1d8] sm:$0xff]  ;;  %v1646_v39 = vmul.f32 %v1128_v24, %v1128_v24  ;;  %1095 = vst.msk [vmem:[#allocation2 + $0x1e8] sm:$0xff] %vm19_vm3, %v1030_v25  ;;  %v1539_v37 = vsel %vm19_vm3, %v1128_v24, 0.0  ;;  %v1735_v15 = vadd.f32 %v1734_v45, %v1733_v21 }
 0x173   :  { %v2066_v44 = vpack.c.bf16 %v3180_v36, %v3180_v36  ;;  %1480 = vst.msk [vmem:[%s3406_s2 + $0xe8] sm:$0xf] %vm1421_vm4, %v2065_v33  ;;  %v1540_v18 = vadd.f32 %v1539_v37, %v1538_v47 }
 0x174   :  { %1449 = vst.msk [vmem:[%s3406_s2 + $0x6c] sm:$0xf] %vm1421_vm4, %v2034_v1  ;;  %v834_v60 = vpop.f32.mrb[60].mxu0  ;;  %v962_v52 = vpop.f32.mrb[60].mxu1  ;;  %v1736_v30 = vsel %vm19_vm3, %v1646_v39, 0.0 }
 0x175   :  { %1481 = vst.msk [vmem:[%s3406_s2 + $0xec] sm:$0xf] %vm1421_vm4, %v2066_v44  ;;  %v999_v58 = vadd.f32 %v834_v60, %v114_v40  ;;  %v836_v9 = vpop.f32.mrb[61].mxu0  ;;  %v1031_v59 = vadd.f32 %v962_v52, %v146_v43  ;;  %v964_v46 = vpop.f32.mrb[61].mxu1  ;;  %v1737_v26 = vadd.f32 %v1736_v30, %v1735_v15  ;;  %v2201_v44 = vld [vmem:[#allocation2 + $0x100] sm:$0xff]  ;;  %v2202_v30 = vld [vmem:[#allocation2 + $0x108] sm:$0xff] }
 0x176   :  { %v1129_v63 = vld [vmem:[#allocation2 + $0xe0] sm:$0xff]  ;;  %v837_v0 = vpop.f32.mrb[62].mxu0  ;;  %v965_v2 = vpop.f32.mrb[62].mxu1  ;;  %v1651_v45 = vmul.f32 %v2201_v44, %v2201_v44  ;;  %v1549_v15 = vsel %vm19_vm3, %v2201_v44, 0.0 }
 0x177   :  { %v3200_v3 = vld [vmem:[#allocation2 + $0x1e0] sm:$0xff]  ;;  %v2035_v6 = vpack.c.bf16 %v1129_v63, %v1129_v63  ;;  %v1541_v10 = vsel %vm19_vm3, %v1129_v63, 0.0  ;;  %v1647_v12 = vmul.f32 %v1129_v63, %v1129_v63  ;;  %1064 = vst.msk [vmem:[#allocation2 + $0xf0] sm:$0xff] %vm19_vm3, %v999_v58  ;;  %v1000_v13 = vadd.f32 %v837_v0, %v115_v4  ;;  %v839_v14 = vpop.f32.mrb[63].mxu0  ;;  %1096 = vst.msk [vmem:[#allocation2 + $0x1f0] sm:$0xff] %vm19_vm3, %v1031_v59  ;;  %v967_v16 = vpop.f32.mrb[63].mxu1 }
 0x178   :  { %v1032_v19 = vadd.f32 %v965_v2, %v147_v62  ;;  %v2067_v27 = vpack.c.bf16 %v3200_v3, %v3200_v3  ;;  %v1542_v50 = vadd.f32 %v1541_v10, %v1540_v18  ;;  %v1652_v63 = vmul.f32 %v2202_v30, %v2202_v30 }
 0x179   :  { %v1130_v41 = vld [vmem:[#allocation2 + $0xe8] sm:$0xff]  ;;  %1450 = vst.msk [vmem:[%s3406_s2 + $0x70] sm:$0xf] %vm1421_vm4, %v2035_v6  ;;  %v1738_v34 = vsel %vm19_vm3, %v1647_v12, 0.0  ;;  %v1746_v10 = vsel %vm19_vm3, %v1651_v45, 0.0  ;;  %v1551_v12 = vsel %vm19_vm3, %v2202_v30, 0.0 }
 0x17a   :  { %v2036_v61 = vpack.c.bf16 %v1130_v41, %v1130_v41  ;;  %v1648_v20 = vmul.f32 %v1130_v41, %v1130_v41  ;;  %1065 = vst.msk [vmem:[#allocation2 + $0xf8] sm:$0xff] %vm19_vm3, %v1000_v13  ;;  %v3213_v23 = vld [vmem:[#allocation2 + $0x1e8] sm:$0xff]  ;;  %1097 = vst.msk [vmem:[#allocation2 + $0x1f8] sm:$0xff] %vm19_vm3, %v1032_v19  ;;  %v1543_v24 = vsel %vm19_vm3, %v1130_v41, 0.0  ;;  %v1739_v25 = vadd.f32 %v1738_v34, %v1737_v26  ;;  %v2203_v13 = vld [vmem:[#allocation2 + $0x110] sm:$0xff] }
 0x17b   :  { %v2068_v55 = vpack.c.bf16 %v3213_v23, %v3213_v23  ;;  %1482 = vst.msk [vmem:[%s3406_s2 + $0xf0] sm:$0xf] %vm1421_vm4, %v2067_v27  ;;  %v1544_v42 = vadd.f32 %v1543_v24, %v1542_v50  ;;  %v1653_v14 = vmul.f32 %v2203_v13, %v2203_v13  ;;  %v1748_v41 = vsel %vm19_vm3, %v1652_v63, 0.0  ;;  %v2204_v27 = vld [vmem:[#allocation2 + $0x118] sm:$0xff]  ;;  %v2209_v63 = vld [vmem:[#allocation2 + $0x140] sm:$0xff] }
 0x17c   :  { %1451 = vst.msk [vmem:[%s3406_s2 + $0x74] sm:$0xf] %vm1421_vm4, %v2036_v61  ;;  %v1740_v33 = vsel %vm19_vm3, %v1648_v20, 0.0  ;;  %v1553_v19 = vsel %vm19_vm3, %v2203_v13, 0.0  ;;  %v1654_v34 = vmul.f32 %v2204_v27, %v2204_v27  ;;  %v1555_v50 = vsel %vm19_vm3, %v2204_v27, 0.0  ;;  %v2210_v13 = vld [vmem:[#allocation2 + $0x148] sm:$0xff] }
 0x17d   :  { %1483 = vst.msk [vmem:[%s3406_s2 + $0xf4] sm:$0xf] %vm1421_vm4, %v2068_v55  ;;  %v1741_v21 = vadd.f32 %v1740_v33, %v1739_v25  ;;  %v1750_v26 = vsel %vm19_vm3, %v1653_v14, 0.0  ;;  %v2205_v55 = vld [vmem:[#allocation2 + $0x120] sm:$0xff]  ;;  %v1660_v14 = vmul.f32 %v2210_v13, %v2210_v13  ;;  %v1661_v27 = vmul.f32 %v2815_v57, %v2815_v57 }
 0x17e   :  { %v1131_v35 = vld [vmem:[#allocation2 + $0xf0] sm:$0xff]  ;;  %v1655_v24 = vmul.f32 %v2205_v55, %v2205_v55  ;;  %v1663_v57 = vmul.f32 %v2864_v32, %v2864_v32 }
 0x17f   :  { %v3232_v1 = vld [vmem:[#allocation2 + $0x1f0] sm:$0xff]  ;;  %v2037_v38 = vpack.c.bf16 %v1131_v35, %v1131_v35  ;;  %v1545_v39 = vsel %vm19_vm3, %v1131_v35, 0.0  ;;  %v1649_v40 = vmul.f32 %v1131_v35, %v1131_v35  ;;  %v1557_v35 = vsel %vm19_vm3, %v2205_v55, 0.0 }
 0x180   :  { %v2069_v43 = vpack.c.bf16 %v3232_v1, %v3232_v1  ;;  %v1546_v47 = vadd.f32 %v1545_v39, %v1544_v42  ;;  %v1752_v42 = vsel %vm19_vm3, %v1654_v34, 0.0  ;;  %v1754_v44 = vsel %vm19_vm3, %v1655_v24, 0.0 }
 0x181   :  { %v1132_v60 = vld [vmem:[#allocation2 + $0xf8] sm:$0xff]  ;;  %1452 = vst.msk [vmem:[%s3406_s2 + $0x78] sm:$0xf] %vm1421_vm4, %v2037_v38  ;;  %v1742_v4 = vsel %vm19_vm3, %v1649_v40, 0.0  ;;  %v2206_v38 = vld [vmem:[#allocation2 + $0x128] sm:$0xff]  ;;  %v1662_v55 = vmul.f32 %v2850_v17, %v2850_v17 }
 0x182   :  { %v2038_v52 = vpack.c.bf16 %v1132_v60, %v1132_v60  ;;  %v1547_v37 = vsel %vm19_vm3, %v1132_v60, 0.0  ;;  %v1650_v58 = vmul.f32 %v1132_v60, %v1132_v60  ;;  %v3243_v9 = vld [vmem:[#allocation2 + $0x1f8] sm:$0xff]  ;;  %1484 = vst.msk [vmem:[%s3406_s2 + $0xf8] sm:$0xf] %vm1421_vm4, %v2069_v43  ;;  %v1743_v59 = vadd.f32 %v1742_v4, %v1741_v21  ;;  %v2207_v21 = vld [vmem:[#allocation2 + $0x130] sm:$0xff] }
 0x183   :  { %v1548_v46 = vadd.f32 %v1547_v37, %v1546_v47  ;;  %v2070_v62 = vpack.c.bf16 %v3243_v9, %v3243_v9  ;;  %v1656_v39 = vmul.f32 %v2206_v38, %v2206_v38  ;;  %v1559_v45 = vsel %vm19_vm3, %v2206_v38, 0.0 }
 0x184   :  { %1453 = vst.msk [vmem:[%s3406_s2 + $0x7c] sm:$0xf] %vm1421_vm4, %v2038_v52  ;;  %v1744_v0 = vsel %vm19_vm3, %v1650_v58, 0.0  ;;  %v1657_v47 = vmul.f32 %v2207_v21, %v2207_v21  ;;  %v1561_v37 = vsel %vm19_vm3, %v2207_v21, 0.0  ;;  %v2208_v58 = vld [vmem:[#allocation2 + $0x138] sm:$0xff]  ;;  %v1770_v21 = vsel %vm19_vm3, %v1663_v57, 0.0 }
 0x185   :  { %v1550_v2 = vadd.f32 %v1549_v15, %v1548_v46  ;;  %v1745_v6 = vadd.f32 %v1744_v0, %v1743_v59  ;;  %1485 = vst.msk [vmem:[%s3406_s2 + $0xfc] sm:$0xf] %vm1421_vm4, %v2070_v62  ;;  %v1756_v52 = vsel %vm19_vm3, %v1656_v39, 0.0  ;;  %v1658_v59 = vmul.f32 %v2208_v58, %v2208_v58  ;;  %s2239_s2 = smov [#allocation3]  }
 0x186   :  { %v1758_v15 = vsel %vm19_vm3, %v1657_v47, 0.0  ;;  %v1563_v30 = vsel %vm19_vm3, %v2208_v58, 0.0  ;;  %v1659_v0 = vmul.f32 %v2209_v63, %v2209_v63  ;;  %v1768_v39 = vsel %vm19_vm3, %v1662_v55, 0.0  ;;  %s1827_s4 = sshll.u32 %s2239_s2, 4  ;;  %s1828_s4 = int_to_ptr.vmem [resolvable:$true] %s1827_s4 }
 0x187   :  { %v1552_v16 = vadd.f32 %v1551_v12, %v1550_v2  ;;  %v1747_v18 = vadd.f32 %v1746_v10, %v1745_v6  ;;  %v1760_v10 = vsel %vm19_vm3, %v1658_v59, 0.0  ;;  %v1565_v12 = vsel %vm19_vm3, %v2209_v63, 0.0  ;;  %s2212_s5 = scalar_lea.vmem %s1828_s4, 128  ;;  %p2217_p1 = scmp.lt.s32.totalorder %s1828_s4, %s1828_s4 }
 0x188   :  { %v1665_v47 = vmul.f32 %v2913_v8, %v2913_v8  ;;  %p2213_p0 = scmp.ne.s32.totalorder %s1828_s4, %s2212_s5  ;;  %p2218_p2 = scmp.lt.s32.totalorder %s2212_s5, %s2212_s5 }
 0x189   :  { %v1554_v61 = vadd.f32 %v1553_v19, %v1552_v16  ;;  %v1749_v20 = vadd.f32 %v1748_v41, %v1747_v18  ;;  %v1762_v41 = vsel %vm19_vm3, %v1659_v0, 0.0  ;;  %v1567_v19 = vsel %vm19_vm3, %v2210_v13, 0.0 }
 0x18a   :  { %v1668_v0 = vmul.f32 %v2998_v11, %v2998_v11  ;;  %p2219_p3 = por %p2218_p2, %p2217_p1 }
 0x18b   :  { %v1556_v25 = vadd.f32 %v1555_v50, %v1554_v61  ;;  %v1751_v33 = vadd.f32 %v1750_v26, %v1749_v20  ;;  %v1764_v20 = vsel %vm19_vm3, %v1660_v14, 0.0  ;;  %v2211_v26 = vld [vmem:[#allocation2 + $0x150] sm:$0xff] }
 0x18c   :  { %v1569_v50 = vsel %vm19_vm3, %v2211_v26, 0.0  ;;  %v1589_v26 = vsel %vm19_vm3, %v3059_v7, 0.0  ;;  %p2220_p4 = pnand %p2219_p3, %p2213_p0 }
 0x18d   :  { %v1558_v40 = vadd.f32 %v1557_v35, %v1556_v25  ;;  %v1753_v43 = vadd.f32 %v1752_v42, %v1751_v33  ;;  %v1766_v33 = vsel %vm19_vm3, %v1661_v27, 0.0  ;;  %v1571_v42 = vsel %vm19_vm3, %v2850_v17, 0.0 }
 0x18e   :  { %v1575_v17 = vsel %vm19_vm3, %v2899_v54, 0.0  ;;  %v1587_v27 = vsel %vm19_vm3, %v3047_v51, 0.0 }
 0x18f   :  { %v1560_v60 = vadd.f32 %v1559_v45, %v1558_v40  ;;  %v1755_v4 = vadd.f32 %v1754_v44, %v1753_v43  ;;  %v1573_v40 = vsel %vm19_vm3, %v2864_v32, 0.0  ;;  %v1664_v43 = vmul.f32 %v2899_v54, %v2899_v54 }
 0x190   :  { %v1577_v32 = vsel %vm19_vm3, %v2913_v8, 0.0  ;;  %v1579_v54 = vsel %vm19_vm3, %v2948_v31, 0.0  ;;  %v1581_v8 = vsel %vm19_vm3, %v2963_v48, 0.0 }
 0x191   :  { %v1562_v46 = vadd.f32 %v1561_v37, %v1560_v60  ;;  %v1757_v62 = vadd.f32 %v1756_v52, %v1755_v4  ;;  %v1772_v52 = vsel %vm19_vm3, %v1664_v43, 0.0  ;;  %v1666_v37 = vmul.f32 %v2948_v31, %v2948_v31 }
 0x192   :  { %v1583_v31 = vsel %vm19_vm3, %v2998_v11, 0.0  ;;  %v1671_v11 = vmul.f32 %v3059_v7, %v3059_v7  ;;  %v1593_v7 = vsel %vm19_vm3, %v3095_v53, 0.0  ;;  %v1675_v43 = vmul.f32 %v3133_v49, %v3133_v49 }
 0x193   :  { %v1564_v2 = vadd.f32 %v1563_v30, %v1562_v46  ;;  %v1759_v6 = vadd.f32 %v1758_v15, %v1757_v62  ;;  %v1774_v46 = vsel %vm19_vm3, %v1665_v47, 0.0  ;;  %v1667_v62 = vmul.f32 %v2963_v48, %v2963_v48 }
 0x194   :  { %v1776_v63 = vsel %vm19_vm3, %v1666_v37, 0.0  ;;  %v1585_v48 = vsel %vm19_vm3, %v3012_v28, 0.0 }
 0x195   :  { %v1761_v16 = vadd.f32 %v1760_v10, %v1759_v6  ;;  %v1566_v18 = vadd.f32 %v1565_v12, %v1564_v2  ;;  %v1778_v10 = vsel %vm19_vm3, %v1667_v62, 0.0  ;;  %v1669_v12 = vmul.f32 %v3012_v28, %v3012_v28 }
 0x196   :  { %v1672_v28 = vmul.f32 %v3089_v29, %v3089_v29 }
 0x197   :  { %v1568_v34 = vadd.f32 %v1567_v19, %v1566_v18  ;;  %v1763_v61 = vadd.f32 %v1762_v41, %v1761_v16  ;;  %v1780_v16 = vsel %vm19_vm3, %v1668_v0, 0.0  ;;  %v1670_v18 = vmul.f32 %v3047_v51, %v3047_v51 }
 0x198   :  { %v1591_v51 = vsel %vm19_vm3, %v3089_v29, 0.0  ;;  %v1595_v29 = vsel %vm19_vm3, %v3113_v5, 0.0  ;;  %v1680_v0 = vmul.f32 %v3213_v23, %v3213_v23 }
 0x199   :  { %v1570_v24 = vadd.f32 %v1569_v50, %v1568_v34  ;;  %v1765_v25 = vadd.f32 %v1764_v20, %v1763_v61  ;;  %v1782_v34 = vsel %vm19_vm3, %v1669_v12, 0.0  ;;  %v1784_v50 = vsel %vm19_vm3, %v1670_v18, 0.0 }
 0x19a   :  { %v1609_v12 = vsel %vm19_vm3, %v3232_v1, 0.0 }
 0x19b   :  { %v1572_v35 = vadd.f32 %v1571_v42, %v1570_v24  ;;  %v1767_v38 = vadd.f32 %v1766_v33, %v1765_v25  ;;  %v1673_v25 = vmul.f32 %v3095_v53, %v3095_v53  ;;  %v1786_v33 = vsel %vm19_vm3, %v1671_v11, 0.0 }
 0x19c   :  { %v1597_v53 = vsel %vm19_vm3, %v3133_v49, 0.0  ;;  %v1601_v49 = vsel %vm19_vm3, %v3166_v22, 0.0 }
 0x19d   :  { %v1574_v44 = vadd.f32 %v1573_v40, %v1572_v35  ;;  %v1769_v45 = vadd.f32 %v1768_v39, %v1767_v38  ;;  %v1674_v35 = vmul.f32 %v3113_v5, %v3113_v5  ;;  %v1788_v38 = vsel %vm19_vm3, %v1672_v28, 0.0 }
 0x19e   :  { %v1599_v5 = vsel %vm19_vm3, %v3146_v56, 0.0 }
 0x19f   :  { %v1576_v60 = vadd.f32 %v1575_v17, %v1574_v44  ;;  %v1771_v4 = vadd.f32 %v1770_v21, %v1769_v45  ;;  %v1790_v44 = vsel %vm19_vm3, %v1673_v25, 0.0  ;;  %v1676_v17 = vmul.f32 %v3146_v56, %v3146_v56 }
 0x1a0   :  { %v1792_v47 = vsel %vm19_vm3, %v1674_v35, 0.0  ;;  %v1603_v56 = vsel %vm19_vm3, %v3180_v36, 0.0 }
 0x1a1   :  { %v1578_v58 = vadd.f32 %v1577_v32, %v1576_v60  ;;  %v1773_v59 = vadd.f32 %v1772_v52, %v1771_v4  ;;  %v1677_v52 = vmul.f32 %v3166_v22, %v3166_v22  ;;  %v1794_v32 = vsel %vm19_vm3, %v1675_v43, 0.0 }
 0x1a2   :  { %v1605_v22 = vsel %vm19_vm3, %v3200_v3, 0.0 }
 0x1a3   :  { %v1580_v15 = vadd.f32 %v1579_v54, %v1578_v58  ;;  %v1775_v30 = vadd.f32 %v1774_v46, %v1773_v59  ;;  %v1678_v59 = vmul.f32 %v3180_v36, %v3180_v36  ;;  %v1796_v46 = vsel %vm19_vm3, %v1676_v17, 0.0 }
 0x1a5   :  { %v1582_v2 = vadd.f32 %v1581_v8, %v1580_v15  ;;  %v1777_v6 = vadd.f32 %v1776_v63, %v1775_v30  ;;  %v1679_v15 = vmul.f32 %v3200_v3, %v3200_v3  ;;  %v1798_v30 = vsel %vm19_vm3, %v1677_v52, 0.0 }
 0x1a7   :  { %v1779_v13 = vadd.f32 %v1778_v10, %v1777_v6  ;;  %v1584_v14 = vadd.f32 %v1583_v31, %v1582_v2  ;;  %v1681_v2 = vmul.f32 %v3232_v1, %v3232_v1  ;;  %v1800_v6 = vsel %vm19_vm3, %v1678_v59, 0.0 }
 0x1a8   :  { %v1607_v31 = vsel %vm19_vm3, %v3213_v23, 0.0 }
 0x1a9   :  { %v1586_v41 = vadd.f32 %v1585_v48, %v1584_v14  ;;  %v1781_v19 = vadd.f32 %v1780_v16, %v1779_v13  ;;  %v1802_v13 = vsel %vm19_vm3, %v1679_v15, 0.0  ;;  %v1682_v16 = vmul.f32 %v3243_v9, %v3243_v9 }
 0x1aa   :  { %v1804_v48 = vsel %vm19_vm3, %v1680_v0, 0.0  ;;  %v1806_v18 = vsel %vm19_vm3, %v1681_v2, 0.0 }
 0x1ab   :  { %v1588_v61 = vadd.f32 %v1587_v27, %v1586_v41  ;;  %v1783_v20 = vadd.f32 %v1782_v34, %v1781_v19  ;;  %v1611_v27 = vsel %vm19_vm3, %v3243_v9, 0.0  ;;  %v1808_v1 = vsel %vm19_vm3, %v1682_v16, 0.0 }
 0x1ad   :  { %v1590_v55 = vadd.f32 %v1589_v26, %v1588_v61  ;;  %v1785_v24 = vadd.f32 %v1784_v50, %v1783_v20 }
 0x1af   :  { %v1592_v42 = vadd.f32 %v1591_v51, %v1590_v55  ;;  %v1787_v57 = vadd.f32 %v1786_v33, %v1785_v24 }
 0x1b1   :  { %v1594_v39 = vadd.f32 %v1593_v7, %v1592_v42  ;;  %v1789_v40 = vadd.f32 %v1788_v38, %v1787_v57 }
 0x1b3   :  { %v1596_v45 = vadd.f32 %v1595_v29, %v1594_v39  ;;  %v1791_v21 = vadd.f32 %v1790_v44, %v1789_v40 }
 0x1b5   :  { %v1598_v60 = vadd.f32 %v1597_v53, %v1596_v45  ;;  %v1793_v4 = vadd.f32 %v1792_v47, %v1791_v21 }
 0x1b7   :  { %v1600_v37 = vadd.f32 %v1599_v5, %v1598_v60  ;;  %v1795_v58 = vadd.f32 %v1794_v32, %v1793_v4 }
 0x1b9   :  { %v1602_v54 = vadd.f32 %v1601_v49, %v1600_v37  ;;  %v1797_v62 = vadd.f32 %v1796_v46, %v1795_v58 }
 0x1bb   :  { %v1604_v63 = vadd.f32 %v1603_v56, %v1602_v54  ;;  %v1799_v8 = vadd.f32 %v1798_v30, %v1797_v62 }
 0x1bd   :  { %v1606_v10 = vadd.f32 %v1605_v22, %v1604_v63  ;;  %v1801_v36 = vadd.f32 %v1800_v6, %v1799_v8 }
 0x1bf   :  { %v1608_v14 = vadd.f32 %v1607_v31, %v1606_v10  ;;  %v1803_v3 = vadd.f32 %v1802_v13, %v1801_v36 }
 0x1c1   :  { %v1610_v41 = vadd.f32 %v1609_v12, %v1608_v14  ;;  %v1805_v19 = vadd.f32 %v1804_v48, %v1803_v3 }
 0x1c3   :  { %v1612_v23 = vadd.f32 %v1611_v27, %v1610_v41  ;;  %v1807_v11 = vadd.f32 %v1806_v18, %v1805_v19 }
 0x1c5   :  { %v1613_v34 = vrot.slane %v1612_v23, 4  ;;  %v1809_v61 = vadd.f32 %v1808_v1, %v1807_v11 }
 0x1c7   :  { %v1614_v20 = vadd.f32 %v1613_v34, %v1612_v23  ;;  %v1810_v26 = vrot.slane %v1809_v61, 4 }
 0x1c9   :  { %v1615_v28 = vrot.slane %v1614_v20, 2  ;;  %v1811_v50 = vadd.f32 %v1810_v26, %v1809_v61 }
 0x1cb   :  { %v1616_v55 = vadd.f32 %v1615_v28, %v1614_v20  ;;  %v1812_v24 = vrot.slane %v1811_v50, 2 }
 0x1cd   :  { %v1617_v51 = vrot.slane %v1616_v55, 1  ;;  %v1813_v25 = vadd.f32 %v1812_v24, %v1811_v50 }
 0x1cf   :  { %v1814_v33 = vrot.slane %v1813_v25, 1  ;;  %v1618_v42 = vadd.f32 %v1617_v51, %v1616_v55 }
 0x1d1   :  { %v1815_v57 = vadd.f32 %v1814_v33, %v1813_v25 }
 0x1d3   :  { %v1816_v9 = vsel %vm673_vm1, %v1618_v42, %v1815_v57 }
 0x1d4   :  { %v1817_v7 = vsel %vm674_vm2, %v1816_v9, 0.0 }
 0x1d5   :  { %1818 = vst.msk [vmem:[#allocation3] sm:$0xff] %vm19_vm3, %v1817_v7 }
 0x1d6   :  { %2223 = shalt.err (!%p2220_p4)
}
 0x1d7   :  { %s2224_s8 = scalar_lea.hbm %s3407_s3, 128 }
 0x1d8   :  { %p2225_p5 = scmp.ne.s32.totalorder %s3407_s3, %s2224_s8  ;;  %p2228_p6 = scmp.lt.u32.totalorder %s2224_s8, %s3407_s3 }
 0x1da   :  { %p2230_p7 = pnand %p2228_p6, %p2225_p5 }
 0x1dc   :  { %2233 = shalt.err (!%p2230_p7)
}
 0x1dd   :  { %1830 = dma.vmem_to_hbm [thread:$0]  %s1828_s4, 128, %s3407_s3, [#allocation4]  }
 0x1de   :  { %2234 = dma.done.wait [#allocation4], 128  }
 0x1df   :  { %2235 = vsyncadd [#allocation4], 4294967168 }
 0x1e0   :  { %1836 = vsyncpa [#allocation4], 1 }

</bundles_post_ra>
